<compile_context>
chip_gen: v7x
topology: tpu7x:2x2x1
jax: 0.10.0
libtpu: 0.0.40
codegen_flags: <defaults>
</compile_context>

<pallas_src>
import jax
import jax.numpy as jnp
import numpy as np
from jax.experimental import pallas as pl
from jax.experimental.pallas import tpu as pltpu

# ---- static problem sizes (consistent with the module's forward) ----
C_IN = 4                      # input_channels
C1, C2, C3 = 32, 64, 128      # conv1/conv2/conv3 (feature_dim) output channels
K = 3                         # kernel_size
L = 16                        # sequence length
L1 = L                        # conv1: stride 1, pad 1 -> 16
L2 = (L1 + 2 - K) // 2 + 1    # conv2: stride 2, pad 1 -> 8
L3 = (L2 + 2 - K) // 2 + 1    # conv3: stride 2, pad 1 -> 4
BN_EPS = 1e-5

D_IN = L * C_IN               # 64   (flattened input lanes)
D1 = L1 * C1                  # 512
D2 = L2 * C2                  # 512
D3 = L3 * C3                  # 512


# ------------------------------- kernel --------------------------------------
def encoder_kernel(x_ref, t1_ref, b1_ref, t2_ref, b2_ref, t3_ref, b3_ref,
                   out_ref):
    """One batch tile per grid step; weights stay resident (constant index map)."""
    # conv1 + folded BN + ReLU   (M=B_TILE, K=64,  N=512)
    h = jnp.dot(x_ref[...], t1_ref[...],
                preferred_element_type=jnp.float32) + b1_ref[...]
    h = jnp.maximum(h, 0.0)
    # conv2 (stride 2) + folded BN + ReLU   (M=B_TILE, K=512, N=512)
    h = jnp.dot(h, t2_ref[...],
                preferred_element_type=jnp.float32) + b2_ref[...]
    h = jnp.maximum(h, 0.0)
    # conv3 (stride 2) + folded BN (with 1/L3 pool scale) + ReLU
    h = jnp.dot(h, t3_ref[...],
                preferred_element_type=jnp.float32) + b3_ref[...]
    h = jnp.maximum(h, 0.0)
    # AdaptiveAvgPool1d(1) + squeeze: 1/L3 already folded into conv3, so this
    # is a sum over L3=4 aligned 128-wide lane slices -> pure VPU adds,
    # no reshape/transpose/XLU work.
    acc = h[:, 0:C3]
    for t in range(1, L3):
        acc = acc + h[:, t * C3:(t + 1) * C3]
    out_ref[...] = acc


# ------------------------------- wrapper --------------------------------------
def _round8(n):
    return ((n + 7) // 8) * 8


def _choose_tiling(batch):
    """Pick (b_tile, b_pad): tiles <=256 rows, padded batch minimal, tile %8==0."""
    n_tiles = max(1, -(-batch // 256))          # cdiv(batch, 256)
    b_tile = _round8(-(-batch // n_tiles))      # cdiv(batch, n_tiles), rounded to 8
    return b_tile, n_tiles * b_tile


def simple_conv_encoder(x, packed):
    """x: (B, L, C_IN) float32 -> (B, C3) float32."""
    (t1, bb1), (t2, bb2), (t3, bb3) = packed
    B = x.shape[0]
    b_tile, b_pad = _choose_tiling(B)

    xf = x.reshape(B, D_IN)                       # free row-major reshape
    if b_pad != B:
        xf = jnp.pad(xf, ((0, b_pad - B), (0, 0)))

    out = pl.pallas_call(
        encoder_kernel,
        out_shape=jax.ShapeDtypeStruct((b_pad, C3), jnp.float32),
        grid_spec=pltpu.PrefetchScalarGridSpec(
            num_scalar_prefetch=0,
            grid=(b_pad // b_tile,),
            in_specs=[
                pl.BlockSpec((b_tile, D_IN), lambda i: (i, 0)),   # input tile
                pl.BlockSpec((D_IN, D1), lambda i: (0, 0)),       # conv1 matrix
                pl.BlockSpec((1, D1), lambda i: (0, 0)),          # conv1 bias
                pl.BlockSpec((D1, D2), lambda i: (0, 0)),         # conv2 matrix
                pl.BlockSpec((1, D2), lambda i: (0, 0)),          # conv2 bias
                pl.BlockSpec((D2, D3), lambda i: (0, 0)),         # conv3 matrix
                pl.BlockSpec((1, D3), lambda i: (0, 0)),          # conv3 bias
            ],
            out_specs=pl.BlockSpec((b_tile, C3), lambda i: (i, 0)),
        ),
        compiler_params=pltpu.CompilerParams(
            dimension_semantics=("parallel",),
            vmem_limit_bytes=64 * 1024 * 1024,
        ),
    )(xf, t1, bb1, t2, bb2, t3, bb3)
    return out[:B]


# --------------------- parameter setup (host-side glue) ---------------------
def _fold_bn(w, b, gamma, beta, mean, var, eps=BN_EPS):
    """Fold eval-mode BatchNorm1d into a (K, Cin, Cout) conv weight + bias."""
    scale = gamma / jnp.sqrt(var + eps)
    return w * scale[None, None, :], (b - mean) * scale + beta


def _conv_toeplitz(w, b, l_in, l_out, stride, post_scale=1.0):
    """Lower a pad-1 Conv1d to a dense (l_in*Cin, l_out*Cout) matrix + tiled bias."""
    k_sz, c_in, c_out = w.shape
    t = jnp.zeros((l_in, c_in, l_out, c_out), jnp.float32)
    for to in range(l_out):
        for k in range(k_sz):
            ti = stride * to + k - 1          # padding = 1
            if 0 <= ti < l_in:
                t = t.at[ti, :, to, :].set(w[k])
    t = t.reshape(l_in * c_in, l_out * c_out) * post_scale
    bias = jnp.tile(b[None, :], (l_out, 1)).reshape(1, l_out * c_out) * post_scale
    return t, bias


def pack_params(params):
    """One-time weight repack: conv -> Toeplitz matmul form (done outside the kernel).

    The 1/L3 average-pool scale is folded into conv3 (positive scale commutes
    with ReLU), so the kernel's pool is a plain sum of lane slices.
    """
    (w1, b1), (w2, b2), (w3, b3) = params
    return (_conv_toeplitz(w1, b1, L, L1, 1),
            _conv_toeplitz(w2, b2, L1, L2, 2),
            _conv_toeplitz(w3, b3, L2, L3, 2, post_scale=1.0 / L3))


def init_params(key):
    ks = jax.random.split(key, 18)

    def conv(kw, kb, cin, cout):
        w = jax.random.normal(kw, (K, cin, cout), jnp.float32) / np.sqrt(K * cin)
        b = 0.1 * jax.random.normal(kb, (cout,), jnp.float32)
        return w, b

    def bn(kg, kb2, km, kv, c):
        gamma = 1.0 + 0.1 * jax.random.normal(kg, (c,), jnp.float32)
        beta = 0.1 * jax.random.normal(kb2, (c,), jnp.float32)
        mean = 0.1 * jax.random.normal(km, (c,), jnp.float32)
        var = 1.0 + 0.1 * jnp.abs(jax.random.normal(kv, (c,), jnp.float32))
        return gamma, beta, mean, var

    w1, b1 = conv(ks[0], ks[1], C_IN, C1)
    w2, b2 = conv(ks[2], ks[3], C1, C2)
    w3, b3 = conv(ks[4], ks[5], C2, C3)
    w1, b1 = _fold_bn(w1, b1, *bn(ks[6], ks[7], ks[8], ks[9], C1))
    w2, b2 = _fold_bn(w2, b2, *bn(ks[10], ks[11], ks[12], ks[13], C2))
    w3, b3 = _fold_bn(w3, b3, *bn(ks[14], ks[15], ks[16], ks[17], C3))
    # TODO(synk): training-mode BatchNorm (batch statistics + running-stat update)
    # has no clean single-kernel equivalent; eval-mode BN is folded instead.
    return (w1, b1), (w2, b2), (w3, b3)


# --------------------------- pure-JAX reference ------------------------------
def _conv_relu_ref(x, w, b, stride):
    lout = (x.shape[1] + 2 - K) // stride + 1
    xp = jnp.pad(x, ((0, 0), (1, 1), (0, 0)))
    acc = jnp.broadcast_to(b[None, None, :], (x.shape[0], lout, b.shape[0]))
    for k in range(K):
        sl = xp[:, k::stride, :][:, :lout, :]
        acc = acc + jnp.einsum("blc,cd->bld", sl, w[k],
                               precision=jax.lax.Precision.HIGHEST)
    return jnp.maximum(acc, 0.0)


def encoder_ref(x, params):
    (w1, b1), (w2, b2), (w3, b3) = params
    h = _conv_relu_ref(x, w1, b1, 1)
    h = _conv_relu_ref(h, w2, b2, 2)
    h = _conv_relu_ref(h, w3, b3, 2)
    return jnp.mean(h, axis=1)


if __name__ == "__main__":
    key = jax.random.PRNGKey(0)
    kx, kp = jax.random.split(key)
    x = jax.random.normal(kx, (2, L, C_IN), jnp.float32)   # (B, seq, channels)
    params = init_params(kp)
    packed = pack_params(params)

    y = simple_conv_encoder(x, packed)
    y = jax.block_until_ready(y)
    assert y.shape == (2, C3) and y.dtype == jnp.float32

    y_ref = encoder_ref(x, params)
    np.testing.assert_allclose(np.asarray(y), np.asarray(y_ref),
                               rtol=2e-2, atol=2e-2)
    print("KERNEL_OK")
</pallas_src>

<mosaic_0001>
module attributes {stable_mosaic.version = 11 : i64} {
  func.func @encoder_kernel(%arg0: i32, %arg1: memref<8x64xf32, #tpu.memory_space<vmem>>, %arg2: memref<64x512xf32, #tpu.memory_space<vmem>>, %arg3: memref<1x512xf32, #tpu.memory_space<vmem>>, %arg4: memref<512x512xf32, #tpu.memory_space<vmem>>, %arg5: memref<1x512xf32, #tpu.memory_space<vmem>>, %arg6: memref<512x512xf32, #tpu.memory_space<vmem>>, %arg7: memref<1x512xf32, #tpu.memory_space<vmem>>, %arg8: memref<8x128xf32, #tpu.memory_space<vmem>>) attributes {dimension_semantics = [#tpu.dimension_semantics<parallel>], iteration_bounds = array<i64: 1>, scalar_prefetch = 0 : i64, scratch_operands = 0 : i64, tpu.core_type = #tpu.core_type<tc>, window_params = [{transform_indices = @transform_0, window_bounds = array<i64: 8, 64>}, {pipeline_mode = #tpu.pipeline_mode<synchronous>, transform_indices = @transform_1, window_bounds = array<i64: 64, 512>}, {pipeline_mode = #tpu.pipeline_mode<synchronous>, transform_indices = @transform_2, window_bounds = array<i64: 1, 512>}, {pipeline_mode = #tpu.pipeline_mode<synchronous>, transform_indices = @transform_3, window_bounds = array<i64: 512, 512>}, {pipeline_mode = #tpu.pipeline_mode<synchronous>, transform_indices = @transform_4, window_bounds = array<i64: 1, 512>}, {pipeline_mode = #tpu.pipeline_mode<synchronous>, transform_indices = @transform_5, window_bounds = array<i64: 512, 512>}, {pipeline_mode = #tpu.pipeline_mode<synchronous>, transform_indices = @transform_6, window_bounds = array<i64: 1, 512>}, {transform_indices = @transform_7, window_bounds = array<i64: 8, 128>}]} {
    %c0 = arith.constant 0 : index
    %c0_0 = arith.constant 0 : index
    %0 = vector.load %arg1[%c0, %c0_0] : memref<8x64xf32, #tpu.memory_space<vmem>>, vector<8x64xf32>
    %c0_1 = arith.constant 0 : index
    %c0_2 = arith.constant 0 : index
    %1 = vector.load %arg2[%c0_1, %c0_2] : memref<64x512xf32, #tpu.memory_space<vmem>>, vector<64x512xf32>
    %cst = arith.constant dense<0.000000e+00> : vector<8x512xf32>
    %2 = tpu.matmul %0, %1, %cst {dimension_numbers = #tpu.dot_dimension_numbers<[1], [0], [0], [1], [0, 0, 1, 1], [], []>} : vector<8x64xf32>, vector<64x512xf32>, vector<8x512xf32> -> vector<8x512xf32>
    %c0_3 = arith.constant 0 : index
    %c0_4 = arith.constant 0 : index
    %3 = vector.load %arg3[%c0_3, %c0_4] : memref<1x512xf32, #tpu.memory_space<vmem>>, vector<1x512xf32>
    %4 = vector.broadcast %3 : vector<1x512xf32> to vector<8x512xf32>
    %5 = arith.addf %2, %4 : vector<8x512xf32>
    %cst_5 = arith.constant 0.000000e+00 : f32
    %6 = vector.broadcast %cst_5 : f32 to vector<8x512xf32>
    %7 = arith.maximumf %5, %6 : vector<8x512xf32>
    %c0_6 = arith.constant 0 : index
    %c0_7 = arith.constant 0 : index
    %8 = vector.load %arg4[%c0_6, %c0_7] : memref<512x512xf32, #tpu.memory_space<vmem>>, vector<512x512xf32>
    %cst_8 = arith.constant dense<0.000000e+00> : vector<8x512xf32>
    %9 = tpu.matmul %7, %8, %cst_8 {dimension_numbers = #tpu.dot_dimension_numbers<[1], [0], [0], [1], [0, 0, 1, 1], [], []>} : vector<8x512xf32>, vector<512x512xf32>, vector<8x512xf32> -> vector<8x512xf32>
    %c0_9 = arith.constant 0 : index
    %c0_10 = arith.constant 0 : index
    %10 = vector.load %arg5[%c0_9, %c0_10] : memref<1x512xf32, #tpu.memory_space<vmem>>, vector<1x512xf32>
    %11 = vector.broadcast %10 : vector<1x512xf32> to vector<8x512xf32>
    %12 = arith.addf %9, %11 : vector<8x512xf32>
    %cst_11 = arith.constant 0.000000e+00 : f32
    %13 = vector.broadcast %cst_11 : f32 to vector<8x512xf32>
    %14 = arith.maximumf %12, %13 : vector<8x512xf32>
    %c0_12 = arith.constant 0 : index
    %c0_13 = arith.constant 0 : index
    %15 = vector.load %arg6[%c0_12, %c0_13] : memref<512x512xf32, #tpu.memory_space<vmem>>, vector<512x512xf32>
    %cst_14 = arith.constant dense<0.000000e+00> : vector<8x512xf32>
    %16 = tpu.matmul %14, %15, %cst_14 {dimension_numbers = #tpu.dot_dimension_numbers<[1], [0], [0], [1], [0, 0, 1, 1], [], []>} : vector<8x512xf32>, vector<512x512xf32>, vector<8x512xf32> -> vector<8x512xf32>
    %c0_15 = arith.constant 0 : index
    %c0_16 = arith.constant 0 : index
    %17 = vector.load %arg7[%c0_15, %c0_16] : memref<1x512xf32, #tpu.memory_space<vmem>>, vector<1x512xf32>
    %18 = vector.broadcast %17 : vector<1x512xf32> to vector<8x512xf32>
    %19 = arith.addf %16, %18 : vector<8x512xf32>
    %cst_17 = arith.constant 0.000000e+00 : f32
    %20 = vector.broadcast %cst_17 : f32 to vector<8x512xf32>
    %21 = arith.maximumf %19, %20 : vector<8x512xf32>
    %22 = vector.extract_strided_slice %21 {offsets = [0, 0], sizes = [8, 128], strides = [1, 1]} : vector<8x512xf32> to vector<8x128xf32>
    %23 = vector.extract_strided_slice %21 {offsets = [0, 128], sizes = [8, 128], strides = [1, 1]} : vector<8x512xf32> to vector<8x128xf32>
    %24 = arith.addf %22, %23 : vector<8x128xf32>
    %25 = vector.extract_strided_slice %21 {offsets = [0, 256], sizes = [8, 128], strides = [1, 1]} : vector<8x512xf32> to vector<8x128xf32>
    %26 = arith.addf %24, %25 : vector<8x128xf32>
    %27 = vector.extract_strided_slice %21 {offsets = [0, 384], sizes = [8, 128], strides = [1, 1]} : vector<8x512xf32> to vector<8x128xf32>
    %28 = arith.addf %26, %27 : vector<8x128xf32>
    %c0_18 = arith.constant 0 : index
    %c0_19 = arith.constant 0 : index
    %29 = vector.load %arg8[%c0_18, %c0_19] : memref<8x128xf32, #tpu.memory_space<vmem>>, vector<8x128xf32>
    tpu.vector_store %arg8[%c0_18, %c0_19], %28 {strides = array<i32>} : memref<8x128xf32, #tpu.memory_space<vmem>>, vector<8x128xf32>,
    return
  }
  func.func @transform_0(%arg0: i32) -> (i32, i32) {
    %c0_i32 = arith.constant 0 : i32
    %c0_i32_0 = arith.constant 0 : i32
    return %arg0, %c0_i32 : i32, i32
  }
  func.func @transform_1(%arg0: i32) -> (i32, i32) {
    %c0_i32 = arith.constant 0 : i32
    %c0_i32_0 = arith.constant 0 : i32
    %c0_i32_1 = arith.constant 0 : i32
    return %c0_i32, %c0_i32_0 : i32, i32
  }
  func.func @transform_2(%arg0: i32) -> (i32, i32) {
    %c0_i32 = arith.constant 0 : i32
    %c0_i32_0 = arith.constant 0 : i32
    %c0_i32_1 = arith.constant 0 : i32
    return %c0_i32, %c0_i32_0 : i32, i32
  }
  func.func @transform_3(%arg0: i32) -> (i32, i32) {
    %c0_i32 = arith.constant 0 : i32
    %c0_i32_0 = arith.constant 0 : i32
    %c0_i32_1 = arith.constant 0 : i32
    return %c0_i32, %c0_i32_0 : i32, i32
  }
  func.func @transform_4(%arg0: i32) -> (i32, i32) {
    %c0_i32 = arith.constant 0 : i32
    %c0_i32_0 = arith.constant 0 : i32
    %c0_i32_1 = arith.constant 0 : i32
    return %c0_i32, %c0_i32_0 : i32, i32
  }
  func.func @transform_5(%arg0: i32) -> (i32, i32) {
    %c0_i32 = arith.constant 0 : i32
    %c0_i32_0 = arith.constant 0 : i32
    %c0_i32_1 = arith.constant 0 : i32
    return %c0_i32, %c0_i32_0 : i32, i32
  }
  func.func @transform_6(%arg0: i32) -> (i32, i32) {
    %c0_i32 = arith.constant 0 : i32
    %c0_i32_0 = arith.constant 0 : i32
    %c0_i32_1 = arith.constant 0 : i32
    return %c0_i32, %c0_i32_0 : i32, i32
  }
  func.func @transform_7(%arg0: i32) -> (i32, i32) {
    %c0_i32 = arith.constant 0 : i32
    %c0_i32_0 = arith.constant 0 : i32
    return %arg0, %c0_i32 : i32, i32
  }
}

</mosaic_0001>

<bundles_post_ra>
// kernel: tpu_custom_call.1
= control target key start
LH: loop header
LB: loop body
LE: loop exit
PB: predicated region body
PF: predicated region fallthrough
CT: control target
= control target key end

     0   :  { %12 = vsyncpa [#allocation3], 0  ;;  %s2434_s0 = inlined_call_operand.hbm [shape: f32[8,64], index: 0, kind: input, shape index: {}]   ;;  %s2435_s1 = inlined_call_operand.hbm [shape: f32[64,512], index: 1, kind: input, shape index: {}]   ;;  %s2436_s2 = inlined_call_operand.hbm [shape: f32[1,512], index: 2, kind: input, shape index: {}]   ;;  %s2437_s3 = inlined_call_operand.hbm [shape: f32[512,512], index: 3, kind: input, shape index: {}]   ;;  %s2438_s4 = inlined_call_operand.hbm [shape: f32[1,512], index: 4, kind: input, shape index: {}]   ;;  %s2439_s5 = inlined_call_operand.hbm [shape: f32[512,512], index: 5, kind: input, shape index: {}]   ;;  %s2440_s6 = inlined_call_operand.hbm [shape: f32[1,512], index: 6, kind: input, shape index: {}]   ;;  %s2441_s7 = inlined_call_operand.hbm [shape: f32[8,128], index: 7, kind: output, shape index: {}]  }
   0x1   :  { %13 = vsyncpa [#allocation6], 0 }
   0x2   :  { %14 = vsyncpa [#allocation9], 0 }
   0x3   :  { %15 = vsyncpa [#allocation12], 0 }
   0x4   :  { %16 = vsyncpa [#allocation4], 0  ;;  %s2232_s24 = smov [#allocation5]   ;;  %s2046_s28 = scalar_lea.hbm %s2435_s1, 4096 }
   0x5   :  { %s32_s25 = sshll.u32 %s2232_s24, 4  ;;  %p2047_p0 = scmp.ne.s32.totalorder %s2435_s1, %s2046_s28  ;;  %s33_s25 = int_to_ptr.vmem [resolvable:$true] %s32_s25 }
   0x6   :  { %p2050_p1 = scmp.lt.u32.totalorder %s2046_s28, %s2435_s1 }
   0x8   :  { %p2052_p2 = pnand %p2050_p1, %p2047_p0 }
   0xa   :  { %2055 = shalt.err (!%p2052_p2)
}
   0xb   :  { %s2056_s10 = scalar_lea.vmem %s33_s25, 4096  ;;  %p2061_p4 = scmp.lt.s32.totalorder %s33_s25, %s33_s25 }
   0xc   :  { %p2057_p3 = scmp.ne.s32.totalorder %s33_s25, %s2056_s10  ;;  %p2062_p5 = scmp.lt.s32.totalorder %s2056_s10, %s2056_s10 }
   0xe   :  { %p2063_p6 = por %p2062_p5, %p2061_p4 }
  0x10   :  { %p2064_p7 = pnand %p2063_p6, %p2057_p3 }
  0x12   :  { %2067 = shalt.err (!%p2064_p7)
}
  0x13   :  { %s2233_s11 = smov 512   ;;  %s2234_s12 = smov 32  }
  0x14   :  { %38 = dma.hbm_to_vmem [thread:$0]  %s2435_s1, 4096, %s33_s25, [#allocation6], %s2233_s11, %s2233_s11, %s2234_s12  }
  0x15   :  { %s2235_s15 = smov [#allocation8]   ;;  %s2236_s17 = smov [#allocation11]  }
  0x16   :  { %s54_s16 = sshll.u32 %s2235_s15, 4  ;;  %s76_s18 = sshll.u32 %s2236_s17, 4  ;;  %s55_s16 = int_to_ptr.vmem [resolvable:$true] %s54_s16  ;;  %s77_s18 = int_to_ptr.vmem [resolvable:$true] %s76_s18 }
  0x17   :  { %s2068_s21 = scalar_lea.hbm %s2437_s3, 32768 }
  0x18   :  { %p2069_p8 = scmp.ne.s32.totalorder %s2437_s3, %s2068_s21  ;;  %p2072_p9 = scmp.lt.u32.totalorder %s2068_s21, %s2437_s3 }
  0x1a   :  { %p2074_p10 = pnand %p2072_p9, %p2069_p8 }
  0x1c   :  { %2077 = shalt.err (!%p2074_p10)
}
  0x1d   :  { %s2078_s1 = scalar_lea.vmem %s55_s16, 32768  ;;  %p2083_p12 = scmp.lt.s32.totalorder %s55_s16, %s55_s16 }
  0x1e   :  { %p2079_p11 = scmp.ne.s32.totalorder %s55_s16, %s2078_s1  ;;  %p2084_p13 = scmp.lt.s32.totalorder %s2078_s1, %s2078_s1 }
  0x20   :  { %p2085_p0 = por %p2084_p13, %p2083_p12 }
  0x22   :  { %p2086_p1 = pnand %p2085_p0, %p2079_p11 }
  0x24   :  { %2089 = shalt.err (!%p2086_p1)
}
  0x25   :  { %60 = dma.hbm_to_vmem [thread:$0]  %s2437_s3, 32768, %s55_s16, [#allocation9], %s2233_s11, %s2233_s11, %s2234_s12  }
  0x26   :  { %s2090_s30 = scalar_lea.hbm %s2439_s5, 32768 }
  0x27   :  { %p2091_p2 = scmp.ne.s32.totalorder %s2439_s5, %s2090_s30  ;;  %p2094_p3 = scmp.lt.u32.totalorder %s2090_s30, %s2439_s5 }
  0x29   :  { %p2096_p4 = pnand %p2094_p3, %p2091_p2 }
  0x2b   :  { %2099 = shalt.err (!%p2096_p4)
}
  0x2c   :  { %s2100_s14 = scalar_lea.vmem %s77_s18, 32768  ;;  %p2105_p6 = scmp.lt.s32.totalorder %s77_s18, %s77_s18 }
  0x2d   :  { %p2101_p5 = scmp.ne.s32.totalorder %s77_s18, %s2100_s14  ;;  %p2106_p7 = scmp.lt.s32.totalorder %s2100_s14, %s2100_s14 }
  0x2f   :  { %p2107_p8 = por %p2106_p7, %p2105_p6 }
  0x31   :  { %p2108_p9 = pnand %p2107_p8, %p2101_p5 }
  0x33   :  { %2111 = shalt.err (!%p2108_p9)
}
  0x34   :  { %82 = dma.hbm_to_vmem [thread:$0]  %s2439_s5, 32768, %s77_s18, [#allocation12], %s2233_s11, %s2233_s11, %s2234_s12  }
  0x35   :  { %s2237_s16 = smov [#allocation2]   ;;  %s2238_s19 = smov [#allocation7]  }
  0x36   :  { %s23_s17 = sshll.u32 %s2237_s16, 4  ;;  %s45_s20 = sshll.u32 %s2238_s19, 4  ;;  %s24_s17 = int_to_ptr.vmem [resolvable:$true] %s23_s17  ;;  %s46_s20 = int_to_ptr.vmem [resolvable:$true] %s45_s20 }
  0x37   :  { %s2112_s23 = scalar_lea.hbm %s2434_s0, 128 }
  0x38   :  { %p2113_p10 = scmp.ne.s32.totalorder %s2434_s0, %s2112_s23  ;;  %p2116_p11 = scmp.lt.u32.totalorder %s2112_s23, %s2434_s0 }
  0x3a   :  { %p2118_p12 = pnand %p2116_p11, %p2113_p10 }
  0x3c   :  { %2121 = shalt.err (!%p2118_p12)
}
  0x3d   :  { %s2122_s5 = scalar_lea.vmem %s24_s17, 128  ;;  %p2127_p0 = scmp.lt.s32.totalorder %s24_s17, %s24_s17 }
  0x3e   :  { %p2123_p13 = scmp.ne.s32.totalorder %s24_s17, %s2122_s5  ;;  %p2128_p1 = scmp.lt.s32.totalorder %s2122_s5, %s2122_s5 }
  0x40   :  { %p2129_p2 = por %p2128_p1, %p2127_p0 }
  0x42   :  { %p2130_p3 = pnand %p2129_p2, %p2123_p13 }
  0x44   :  { %2133 = shalt.err (!%p2130_p3)
}
  0x45   :  { %26 = dma.hbm_to_vmem [thread:$0]  %s2434_s0, 128, %s24_s17, [#allocation3]  }
  0x46   :  { %s2134_s28 = scalar_lea.hbm %s2436_s2, 64 }
  0x47   :  { %p2135_p4 = scmp.ne.s32.totalorder %s2436_s2, %s2134_s28  ;;  %p2138_p5 = scmp.lt.u32.totalorder %s2134_s28, %s2436_s2 }
  0x49   :  { %p2140_p6 = pnand %p2138_p5, %p2135_p4 }
  0x4b   :  { %2143 = shalt.err (!%p2140_p6)
}
  0x4c   :  { %s2144_s10 = scalar_lea.vmem %s46_s20, 64  ;;  %p2149_p8 = scmp.lt.s32.totalorder %s46_s20, %s46_s20 }
  0x4d   :  { %p2145_p7 = scmp.ne.s32.totalorder %s46_s20, %s2144_s10  ;;  %p2150_p9 = scmp.lt.s32.totalorder %s2144_s10, %s2144_s10 }
  0x4f   :  { %p2151_p10 = por %p2150_p9, %p2149_p8 }
  0x51   :  { %p2152_p11 = pnand %p2151_p10, %p2145_p7 }
  0x53   :  { %2155 = shalt.err (!%p2152_p11)
}
  0x54   :  { %48 = dma.hbm_to_vmem [thread:$0]  %s2436_s2, 64, %s46_s20, [#allocation6]  }
  0x55   :  { %s2239_s14 = smov [#allocation10]   ;;  %s2240_s15 = smov [#allocation13]  }
  0x56   :  { %s67_s3 = sshll.u32 %s2239_s14, 4  ;;  %s89_s16 = sshll.u32 %s2240_s15, 4  ;;  %s68_s3 = int_to_ptr.vmem [resolvable:$true] %s67_s3  ;;  %s90_s16 = int_to_ptr.vmem [resolvable:$true] %s89_s16 }
  0x57   :  { %s2156_s21 = scalar_lea.hbm %s2438_s4, 64 }
  0x58   :  { %p2157_p12 = scmp.ne.s32.totalorder %s2438_s4, %s2156_s21  ;;  %p2160_p13 = scmp.lt.u32.totalorder %s2156_s21, %s2438_s4 }
  0x5a   :  { %p2162_p0 = pnand %p2160_p13, %p2157_p12 }
  0x5c   :  { %2165 = shalt.err (!%p2162_p0)
}
  0x5d   :  { %s2166_s2 = scalar_lea.vmem %s68_s3, 64  ;;  %p2171_p2 = scmp.lt.s32.totalorder %s68_s3, %s68_s3 }
  0x5e   :  { %p2167_p1 = scmp.ne.s32.totalorder %s68_s3, %s2166_s2  ;;  %p2172_p3 = scmp.lt.s32.totalorder %s2166_s2, %s2166_s2 }
  0x60   :  { %p2173_p4 = por %p2172_p3, %p2171_p2 }
  0x62   :  { %p2174_p5 = pnand %p2173_p4, %p2167_p1 }
  0x64   :  { %2177 = shalt.err (!%p2174_p5)
}
  0x65   :  { %70 = dma.hbm_to_vmem [thread:$0]  %s2438_s4, 64, %s68_s3, [#allocation9]  }
  0x66   :  { %s2178_s11 = scalar_lea.hbm %s2440_s6, 64 }
  0x67   :  { %p2179_p6 = scmp.ne.s32.totalorder %s2440_s6, %s2178_s11  ;;  %p2182_p7 = scmp.lt.u32.totalorder %s2178_s11, %s2440_s6 }
  0x69   :  { %p2184_p8 = pnand %p2182_p7, %p2179_p6 }
  0x6b   :  { %2187 = shalt.err (!%p2184_p8)
}
  0x6c   :  { %s2188_s29 = scalar_lea.vmem %s90_s16, 64  ;;  %p2193_p10 = scmp.lt.s32.totalorder %s90_s16, %s90_s16 }
  0x6d   :  { %p2189_p9 = scmp.ne.s32.totalorder %s90_s16, %s2188_s29  ;;  %p2194_p11 = scmp.lt.s32.totalorder %s2188_s29, %s2188_s29 }
  0x6f   :  { %p2195_p12 = por %p2194_p11, %p2193_p10 }
  0x71   :  { %p2196_p13 = pnand %p2195_p12, %p2189_p9 }
  0x73   :  { %2199 = shalt.err (!%p2196_p13)
}
  0x74   :  { %92 = dma.hbm_to_vmem [thread:$0]  %s2440_s6, 64, %s90_s16, [#allocation12]  }
  0x75   :  { %2222 = dma.done.wait [#allocation3], 128  }
  0x76   :  { %2223 = vsyncadd [#allocation3], 4294967168 }
  0x77   :  { %2224 = dma.done.wait [#allocation6], 4160  }
  0x78   :  { %2225 = vsyncadd [#allocation6], 4294963136 }
  0x79   :  { %2226 = dma.done.wait [#allocation9], 32832  }
  0x7a   :  { %2227 = vsyncadd [#allocation9], 4294934464 }
  0x7b   :  { %2228 = dma.done.wait [#allocation12], 32832  }
  0x7c   :  { %2229 = vsyncadd [#allocation12], 4294934464  ;;  %v2241_v0 = vmov 0.0   ;;  %v116_v1 = vld [vmem:[#allocation5 + $0x8] sm:$0xff]  ;;  %v115_v3 = vld [vmem:[#allocation5] sm:$0xff]  ;;  %vm169_vm0 = vcmask 523264  }
  0x7d   :  { %237 = vmatprep.mubr.f32.mxu0 %v2241_v0  ;;  %308 = vmatprep.mubr.f32.mxu1 %v2241_v0  ;;  %v120_v2 = vld [vmem:[#allocation5 + $0x28] sm:$0xff]  ;;  %v119_v5 = vld [vmem:[#allocation5 + $0x20] sm:$0xff]  ;;  %v118_v20 = vld [vmem:[#allocation5 + $0x18] sm:$0xff]  ;;  %s2242_s6 = smov [#allocation14]  }
  0x7e   :  { %v1475_v4 = vpack.c.bf16 %v120_v2, %v116_v1  ;;  %v124_v6 = vld [vmem:[#allocation5 + $0x48] sm:$0xff]  ;;  %v1477_v8 = vpack.c.bf16 %v119_v5, %v115_v3  ;;  %v123_v10 = vld [vmem:[#allocation5 + $0x40] sm:$0xff]  ;;  %v122_v21 = vld [vmem:[#allocation5 + $0x38] sm:$0xff]  ;;  %s1461_s8 = sshll.u32 %s2242_s6, 4  ;;  %s1462_s8 = int_to_ptr.vmem [resolvable:$true] %s1461_s8 }
  0x7f   :  { %v128_v7 = vld [vmem:[#allocation5 + $0x68] sm:$0xff]  ;;  %v127_v11 = vld [vmem:[#allocation5 + $0x60] sm:$0xff]  ;;  %v117_v22 = vld [vmem:[#allocation5 + $0x10] sm:$0xff]  ;;  %v1491_v24 = vpack.c.bf16 %v122_v21, %v118_v20  ;;  %s2200_s9 = scalar_lea.vmem %s1462_s8, 128  ;;  %p2205_p1 = scmp.lt.s32.totalorder %s1462_s8, %s1462_s8 }
  0x80   :  { %v1479_v9 = vpack.c.bf16 %v128_v7, %v124_v6  ;;  %v132_v12 = vld [vmem:[#allocation5 + $0x88] sm:$0xff]  ;;  %1476 = vmatprep.subr.bf16.mxu0 %v1475_v4  ;;  %v1481_v14 = vpack.c.bf16 %v127_v11, %v123_v10  ;;  %v131_v15 = vld [vmem:[#allocation5 + $0x80] sm:$0xff]  ;;  %v121_v23 = vld [vmem:[#allocation5 + $0x30] sm:$0xff]  ;;  %p2201_p0 = scmp.ne.s32.totalorder %s1462_s8, %s2200_s9  ;;  %p2206_p2 = scmp.lt.s32.totalorder %s2200_s9, %s2200_s9 }
  0x81   :  { %v136_v13 = vld [vmem:[#allocation5 + $0xa8] sm:$0xff]  ;;  %1478 = vmatpush1.bf16.msra.mxu0 %v1477_v8  ;;  %v135_v16 = vld [vmem:[#allocation5 + $0xa0] sm:$0xff]  ;;  %v1493_v25 = vpack.c.bf16 %v121_v23, %v117_v22  ;;  %v126_v26 = vld [vmem:[#allocation5 + $0x58] sm:$0xff]  ;;  %1492 = vmatprep.subr.bf16.mxu1 %v1491_v24 }
  0x82   :  { %1480 = vmatprep.subr.bf16.mxu0 %v1479_v9  ;;  %v1483_v17 = vpack.c.bf16 %v136_v13, %v132_v12  ;;  %v140_v18 = vld [vmem:[#allocation5 + $0xc8] sm:$0xff]  ;;  %v130_v27 = vld [vmem:[#allocation5 + $0x78] sm:$0xff]  ;;  %v125_v28 = vld [vmem:[#allocation5 + $0x50] sm:$0xff]  ;;  %v1485_v29 = vpack.c.bf16 %v135_v16, %v131_v15  ;;  %p2207_p3 = por %p2206_p2, %p2205_p1 }
  0x83   :  { %v144_v19 = vld [vmem:[#allocation5 + $0xe8] sm:$0xff]  ;;  %v1495_v30 = vpack.c.bf16 %v130_v27, %v126_v26  ;;  %v129_v31 = vld [vmem:[#allocation5 + $0x70] sm:$0xff]  ;;  %v134_v32 = vld [vmem:[#allocation5 + $0x98] sm:$0xff]  ;;  %1494 = vmatpush1.bf16.msra.mxu1 %v1493_v25 }
  0x84   :  { %v138_v33 = vld [vmem:[#allocation5 + $0xb8] sm:$0xff]  ;;  %v1487_v34 = vpack.c.bf16 %v144_v19, %v140_v18  ;;  %v139_v35 = vld [vmem:[#allocation5 + $0xc0] sm:$0xff]  ;;  %v1497_v37 = vpack.c.bf16 %v129_v31, %v125_v28  ;;  %v133_v38 = vld [vmem:[#allocation5 + $0x90] sm:$0xff]  ;;  %p2208_p4 = pnand %p2207_p3, %p2201_p0 }
  0x85   :  { %1482 = vmatpush1.bf16.msra.mxu0 %v1481_v14  ;;  %v143_v36 = vld [vmem:[#allocation5 + $0xe0] sm:$0xff]  ;;  %1496 = vmatprep.subr.bf16.mxu1 %v1495_v30  ;;  %v1499_v39 = vpack.c.bf16 %v138_v33, %v134_v32  ;;  %v137_v40 = vld [vmem:[#allocation5 + $0xb0] sm:$0xff]  ;;  %v142_v44 = vld [vmem:[#allocation5 + $0xd8] sm:$0xff] }
  0x86   :  { %1484 = vmatprep.subr.bf16.mxu0 %v1483_v17  ;;  %v320_v41 = vld [vmem:[#allocation8 + $0x8] sm:$0xff]  ;;  %v1489_v43 = vpack.c.bf16 %v143_v36, %v139_v35  ;;  %v146_v45 = vld [vmem:[#allocation5 + $0xf8] sm:$0xff]  ;;  %v319_v47 = vld [vmem:[#allocation8] sm:$0xff]  ;;  %v1501_v49 = vpack.c.bf16 %v137_v40, %v133_v38 }
  0x87   :  { %v324_v42 = vld [vmem:[#allocation8 + $0x28] sm:$0xff]  ;;  %v323_v48 = vld [vmem:[#allocation8 + $0x20] sm:$0xff]  ;;  %1498 = vmatpush1.bf16.msra.mxu1 %v1497_v37  ;;  %v1503_v52 = vpack.c.bf16 %v146_v45, %v142_v44  ;;  %v114_v55 = vld [vmem:[#allocation2] sm:$0xff] }
  0x88   :  { %v1507_v46 = vpack.c.bf16 %v324_v42, %v320_v41  ;;  %v328_v50 = vld [vmem:[#allocation8 + $0x48] sm:$0xff]  ;;  %1500 = vmatprep.subr.bf16.mxu1 %v1499_v39  ;;  %v322_v56 = vld [vmem:[#allocation8 + $0x18] sm:$0xff]  ;;  %v1509_v58 = vpack.c.bf16 %v323_v48, %v319_v47  ;;  %v327_v60 = vld [vmem:[#allocation8 + $0x40] sm:$0xff] }
  0x89   :  { %1486 = vmatpush1.bf16.msra.mxu0 %v1485_v29  ;;  %v332_v51 = vld [vmem:[#allocation8 + $0x68] sm:$0xff]  ;;  %v326_v57 = vld [vmem:[#allocation8 + $0x38] sm:$0xff]  ;;  %v331_v61 = vld [vmem:[#allocation8 + $0x60] sm:$0xff] }
  0x8a   :  { %1488 = vmatprep.subr.bf16.mxu0 %v1487_v34  ;;  %v141_v53 = vld [vmem:[#allocation5 + $0xd0] sm:$0xff]  ;;  %v1511_v59 = vpack.c.bf16 %v332_v51, %v328_v50  ;;  %v1635_v1 = vpack.c.bf16 %v326_v57, %v322_v56  ;;  %v330_v4 = vld [vmem:[#allocation8 + $0x58] sm:$0xff]  ;;  %v1513_v6 = vpack.c.bf16 %v331_v61, %v327_v60  ;;  %v335_v8 = vld [vmem:[#allocation8 + $0x80] sm:$0xff] }
  0x8b   :  { %v145_v54 = vld [vmem:[#allocation5 + $0xf0] sm:$0xff]  ;;  %1502 = vmatpush1.bf16.msra.mxu1 %v1501_v49  ;;  %v334_v5 = vld [vmem:[#allocation8 + $0x78] sm:$0xff]  ;;  %v339_v9 = vld [vmem:[#allocation8 + $0xa0] sm:$0xff] }
  0x8c   :  { %v1505_v62 = vpack.c.bf16 %v145_v54, %v141_v53  ;;  %v336_v63 = vld [vmem:[#allocation8 + $0x88] sm:$0xff]  ;;  %1504 = vmatprep.subr.bf16.mxu1 %v1503_v52  ;;  %v321_v2 = vld [vmem:[#allocation8 + $0x10] sm:$0xff]  ;;  %v1639_v13 = vpack.c.bf16 %v334_v5, %v330_v4  ;;  %v338_v16 = vld [vmem:[#allocation8 + $0x98] sm:$0xff]  ;;  %v1517_v18 = vpack.c.bf16 %v339_v9, %v335_v8 }
  0x8d   :  { %1490 = vmatpush1.bf16.msra.mxu0 %v1489_v43  ;;  %v340_v0 = vld [vmem:[#allocation8 + $0xa8] sm:$0xff]  ;;  %v325_v3 = vld [vmem:[#allocation8 + $0x30] sm:$0xff]  ;;  %v342_v17 = vld [vmem:[#allocation8 + $0xb8] sm:$0xff] }
  0x8e   :  { %1508 = vmatprep.subr.bf16.mxu0 %v1507_v46  ;;  %v1515_v7 = vpack.c.bf16 %v340_v0, %v336_v63  ;;  %v1637_v10 = vpack.c.bf16 %v325_v3, %v321_v2  ;;  %v344_v11 = vld [vmem:[#allocation8 + $0xc8] sm:$0xff]  ;;  %v329_v14 = vld [vmem:[#allocation8 + $0x50] sm:$0xff]  ;;  %v343_v20 = vld [vmem:[#allocation8 + $0xc0] sm:$0xff]  ;;  %v1643_v25 = vpack.c.bf16 %v342_v17, %v338_v16 }
  0x8f   :  { %1506 = vmatpush1.bf16.msra.mxu1 %v1505_v62  ;;  %v348_v12 = vld [vmem:[#allocation8 + $0xe8] sm:$0xff]  ;;  %v333_v15 = vld [vmem:[#allocation8 + $0x70] sm:$0xff]  ;;  %v347_v21 = vld [vmem:[#allocation8 + $0xe0] sm:$0xff] }
  0x90   :  { %1473 = vmatmul.mubr.msk.f32.vlgmr.msra.gmra.mrb[0].mxu0 %vm169_vm0, %v114_v55  ;;  %1636 = vmatprep.subr.bf16.mxu1 %v1635_v1  ;;  %v1519_v19 = vpack.c.bf16 %v348_v12, %v344_v11  ;;  %v1641_v22 = vpack.c.bf16 %v333_v15, %v329_v14  ;;  %v352_v23 = vld [vmem:[#allocation8 + $0x108] sm:$0xff]  ;;  %v337_v26 = vld [vmem:[#allocation8 + $0x90] sm:$0xff]  ;;  %v346_v28 = vld [vmem:[#allocation8 + $0xd8] sm:$0xff]  ;;  %v1521_v30 = vpack.c.bf16 %v347_v21, %v343_v20 }
  0x91   :  { %1510 = vmatpush1.bf16.msra.mxu0 %v1509_v58  ;;  %v356_v24 = vld [vmem:[#allocation8 + $0x128] sm:$0xff]  ;;  %v341_v27 = vld [vmem:[#allocation8 + $0xb0] sm:$0xff]  ;;  %v350_v29 = vld [vmem:[#allocation8 + $0xf8] sm:$0xff] }
  0x92   :  { %1512 = vmatprep.subr.bf16.mxu0 %v1511_v59  ;;  %1474 = vmatmul.mubr.msk.f32.vlgmr.msra.gmra.mrb[0].mxu1 %vm169_vm0, %v114_v55  ;;  %v1523_v31 = vpack.c.bf16 %v356_v24, %v352_v23  ;;  %v351_v32 = vld [vmem:[#allocation8 + $0x100] sm:$0xff]  ;;  %v1645_v34 = vpack.c.bf16 %v341_v27, %v337_v26  ;;  %v360_v35 = vld [vmem:[#allocation8 + $0x148] sm:$0xff]  ;;  %v1647_v37 = vpack.c.bf16 %v350_v29, %v346_v28  ;;  %v345_v38 = vld [vmem:[#allocation8 + $0xd0] sm:$0xff] }
  0x93   :  { %1638 = vmatpush1.bf16.msra.mxu1 %v1637_v10  ;;  %v355_v33 = vld [vmem:[#allocation8 + $0x120] sm:$0xff]  ;;  %v364_v36 = vld [vmem:[#allocation8 + $0x168] sm:$0xff]  ;;  %v349_v39 = vld [vmem:[#allocation8 + $0xf0] sm:$0xff] }
  0x94   :  { %1640 = vmatprep.subr.bf16.mxu1 %v1639_v13  ;;  %v354_v40 = vld [vmem:[#allocation8 + $0x118] sm:$0xff]  ;;  %v1525_v42 = vpack.c.bf16 %v355_v33, %v351_v32  ;;  %v1527_v43 = vpack.c.bf16 %v364_v36, %v360_v35  ;;  %v359_v44 = vld [vmem:[#allocation8 + $0x140] sm:$0xff]  ;;  %v1649_v46 = vpack.c.bf16 %v349_v39, %v345_v38  ;;  %v368_v47 = vld [vmem:[#allocation8 + $0x188] sm:$0xff] }
  0x95   :  { %1514 = vmatpush1.bf16.msra.mxu0 %v1513_v6  ;;  %v358_v41 = vld [vmem:[#allocation8 + $0x138] sm:$0xff]  ;;  %v363_v45 = vld [vmem:[#allocation8 + $0x160] sm:$0xff]  ;;  %v372_v48 = vld [vmem:[#allocation8 + $0x1a8] sm:$0xff] }
  0x96   :  { %1516 = vmatprep.subr.bf16.mxu0 %v1515_v7  ;;  %v1651_v49 = vpack.c.bf16 %v358_v41, %v354_v40  ;;  %v353_v50 = vld [vmem:[#allocation8 + $0x110] sm:$0xff]  ;;  %v362_v52 = vld [vmem:[#allocation8 + $0x158] sm:$0xff]  ;;  %v1529_v54 = vpack.c.bf16 %v363_v45, %v359_v44  ;;  %v1531_v55 = vpack.c.bf16 %v372_v48, %v368_v47  ;;  %v367_v56 = vld [vmem:[#allocation8 + $0x180] sm:$0xff] }
  0x97   :  { %1642 = vmatpush1.bf16.msra.mxu1 %v1641_v22  ;;  %v357_v51 = vld [vmem:[#allocation8 + $0x130] sm:$0xff]  ;;  %v366_v53 = vld [vmem:[#allocation8 + $0x178] sm:$0xff]  ;;  %v371_v57 = vld [vmem:[#allocation8 + $0x1a0] sm:$0xff] }
  0x98   :  { %1644 = vmatprep.subr.bf16.mxu1 %v1643_v25  ;;  %v1653_v58 = vpack.c.bf16 %v357_v51, %v353_v50  ;;  %v376_v59 = vld [vmem:[#allocation8 + $0x1c8] sm:$0xff]  ;;  %v1655_v61 = vpack.c.bf16 %v366_v53, %v362_v52  ;;  %v361_v62 = vld [vmem:[#allocation8 + $0x150] sm:$0xff]  ;;  %v370_v0 = vld [vmem:[#allocation8 + $0x198] sm:$0xff]  ;;  %v1533_v2 = vpack.c.bf16 %v371_v57, %v367_v56 }
  0x99   :  { %1518 = vmatpush1.bf16.msra.mxu0 %v1517_v18  ;;  %v380_v60 = vld [vmem:[#allocation8 + $0x1e8] sm:$0xff]  ;;  %v365_v63 = vld [vmem:[#allocation8 + $0x170] sm:$0xff]  ;;  %v374_v1 = vld [vmem:[#allocation8 + $0x1b8] sm:$0xff] }
  0x9a   :  { %1520 = vmatprep.subr.bf16.mxu0 %v1519_v19  ;;  %v1535_v3 = vpack.c.bf16 %v380_v60, %v376_v59  ;;  %v375_v4 = vld [vmem:[#allocation8 + $0x1c0] sm:$0xff]  ;;  %v1657_v6 = vpack.c.bf16 %v365_v63, %v361_v62  ;;  %v384_v7 = vld [vmem:[#allocation8 + $0x208] sm:$0xff]  ;;  %v1659_v9 = vpack.c.bf16 %v374_v1, %v370_v0  ;;  %v369_v10 = vld [vmem:[#allocation8 + $0x190] sm:$0xff] }
  0x9b   :  { %1646 = vmatpush1.bf16.msra.mxu1 %v1645_v34  ;;  %v379_v5 = vld [vmem:[#allocation8 + $0x1e0] sm:$0xff]  ;;  %v388_v8 = vld [vmem:[#allocation8 + $0x228] sm:$0xff]  ;;  %v373_v11 = vld [vmem:[#allocation8 + $0x1b0] sm:$0xff] }
  0x9c   :  { %1648 = vmatprep.subr.bf16.mxu1 %v1647_v37  ;;  %v378_v12 = vld [vmem:[#allocation8 + $0x1d8] sm:$0xff]  ;;  %v1537_v14 = vpack.c.bf16 %v379_v5, %v375_v4  ;;  %v1539_v15 = vpack.c.bf16 %v388_v8, %v384_v7  ;;  %v383_v16 = vld [vmem:[#allocation8 + $0x200] sm:$0xff]  ;;  %v1661_v18 = vpack.c.bf16 %v373_v11, %v369_v10  ;;  %v392_v19 = vld [vmem:[#allocation8 + $0x248] sm:$0xff] }
  0x9d   :  { %1522 = vmatpush1.bf16.msra.mxu0 %v1521_v30  ;;  %v382_v13 = vld [vmem:[#allocation8 + $0x1f8] sm:$0xff]  ;;  %v387_v17 = vld [vmem:[#allocation8 + $0x220] sm:$0xff]  ;;  %v396_v20 = vld [vmem:[#allocation8 + $0x268] sm:$0xff] }
  0x9e   :  { %1524 = vmatprep.subr.bf16.mxu0 %v1523_v31  ;;  %v1663_v21 = vpack.c.bf16 %v382_v13, %v378_v12  ;;  %v377_v22 = vld [vmem:[#allocation8 + $0x1d0] sm:$0xff]  ;;  %v386_v24 = vld [vmem:[#allocation8 + $0x218] sm:$0xff]  ;;  %v1541_v26 = vpack.c.bf16 %v387_v17, %v383_v16  ;;  %v1543_v27 = vpack.c.bf16 %v396_v20, %v392_v19  ;;  %v391_v28 = vld [vmem:[#allocation8 + $0x240] sm:$0xff] }
  0x9f   :  { %1650 = vmatpush1.bf16.msra.mxu1 %v1649_v46  ;;  %v381_v23 = vld [vmem:[#allocation8 + $0x1f0] sm:$0xff]  ;;  %v390_v25 = vld [vmem:[#allocation8 + $0x238] sm:$0xff]  ;;  %v395_v29 = vld [vmem:[#allocation8 + $0x260] sm:$0xff] }
  0xa0   :  { %1652 = vmatprep.subr.bf16.mxu1 %v1651_v49  ;;  %v1665_v30 = vpack.c.bf16 %v381_v23, %v377_v22  ;;  %v400_v31 = vld [vmem:[#allocation8 + $0x288] sm:$0xff]  ;;  %v1667_v33 = vpack.c.bf16 %v390_v25, %v386_v24  ;;  %v385_v34 = vld [vmem:[#allocation8 + $0x210] sm:$0xff]  ;;  %v394_v36 = vld [vmem:[#allocation8 + $0x258] sm:$0xff]  ;;  %v1545_v38 = vpack.c.bf16 %v395_v29, %v391_v28 }
  0xa1   :  { %1526 = vmatpush1.bf16.msra.mxu0 %v1525_v42  ;;  %v404_v32 = vld [vmem:[#allocation8 + $0x2a8] sm:$0xff]  ;;  %v389_v35 = vld [vmem:[#allocation8 + $0x230] sm:$0xff]  ;;  %v398_v37 = vld [vmem:[#allocation8 + $0x278] sm:$0xff] }
  0xa2   :  { %1528 = vmatprep.subr.bf16.mxu0 %v1527_v43  ;;  %v1547_v39 = vpack.c.bf16 %v404_v32, %v400_v31  ;;  %v399_v40 = vld [vmem:[#allocation8 + $0x280] sm:$0xff]  ;;  %v1669_v42 = vpack.c.bf16 %v389_v35, %v385_v34  ;;  %v408_v43 = vld [vmem:[#allocation8 + $0x2c8] sm:$0xff]  ;;  %v1671_v45 = vpack.c.bf16 %v398_v37, %v394_v36  ;;  %v393_v46 = vld [vmem:[#allocation8 + $0x250] sm:$0xff] }
  0xa3   :  { %1654 = vmatpush1.bf16.msra.mxu1 %v1653_v58  ;;  %v403_v41 = vld [vmem:[#allocation8 + $0x2a0] sm:$0xff]  ;;  %v412_v44 = vld [vmem:[#allocation8 + $0x2e8] sm:$0xff]  ;;  %v397_v47 = vld [vmem:[#allocation8 + $0x270] sm:$0xff] }
  0xa4   :  { %1656 = vmatprep.subr.bf16.mxu1 %v1655_v61  ;;  %v402_v48 = vld [vmem:[#allocation8 + $0x298] sm:$0xff]  ;;  %v1549_v50 = vpack.c.bf16 %v403_v41, %v399_v40  ;;  %v1551_v51 = vpack.c.bf16 %v412_v44, %v408_v43  ;;  %v407_v52 = vld [vmem:[#allocation8 + $0x2c0] sm:$0xff]  ;;  %v420_v56 = vld [vmem:[#allocation8 + $0x328] sm:$0xff] }
  0xa5   :  { %1530 = vmatpush1.bf16.msra.mxu0 %v1529_v54  ;;  %v406_v49 = vld [vmem:[#allocation8 + $0x2b8] sm:$0xff]  ;;  %v411_v53 = vld [vmem:[#allocation8 + $0x2e0] sm:$0xff]  ;;  %v1673_v54 = vpack.c.bf16 %v397_v47, %v393_v46  ;;  %v401_v58 = vld [vmem:[#allocation8 + $0x290] sm:$0xff] }
  0xa6   :  { %1532 = vmatprep.subr.bf16.mxu0 %v1531_v55  ;;  %v416_v55 = vld [vmem:[#allocation8 + $0x308] sm:$0xff]  ;;  %v1675_v57 = vpack.c.bf16 %v406_v49, %v402_v48  ;;  %v405_v59 = vld [vmem:[#allocation8 + $0x2b0] sm:$0xff]  ;;  %v410_v60 = vld [vmem:[#allocation8 + $0x2d8] sm:$0xff]  ;;  %v1553_v62 = vpack.c.bf16 %v411_v53, %v407_v52 }
  0xa7   :  { %1658 = vmatpush1.bf16.msra.mxu1 %v1657_v6  ;;  %v414_v61 = vld [vmem:[#allocation8 + $0x2f8] sm:$0xff]  ;;  %v1555_v63 = vpack.c.bf16 %v420_v56, %v416_v55  ;;  %v415_v0 = vld [vmem:[#allocation8 + $0x300] sm:$0xff]  ;;  %v428_v4 = vld [vmem:[#allocation8 + $0x368] sm:$0xff]  ;;  %v149_v56 = vlaneseq }
  0xa8   :  { %1660 = vmatprep.subr.bf16.mxu1 %v1659_v9  ;;  %v419_v1 = vld [vmem:[#allocation8 + $0x320] sm:$0xff]  ;;  %v1679_v5 = vpack.c.bf16 %v414_v61, %v410_v60  ;;  %v409_v6 = vld [vmem:[#allocation8 + $0x2d0] sm:$0xff]  ;;  %v418_v8 = vld [vmem:[#allocation8 + $0x318] sm:$0xff] }
  0xa9   :  { %1534 = vmatpush1.bf16.msra.mxu0 %v1533_v2  ;;  %v1677_v2 = vpack.c.bf16 %v405_v59, %v401_v58  ;;  %v413_v7 = vld [vmem:[#allocation8 + $0x2f0] sm:$0xff]  ;;  %v422_v9 = vld [vmem:[#allocation8 + $0x338] sm:$0xff]  ;;  %v1557_v10 = vpack.c.bf16 %v419_v1, %v415_v0  ;;  %v423_v12 = vld [vmem:[#allocation8 + $0x340] sm:$0xff] }
  0xaa   :  { %1536 = vmatprep.subr.bf16.mxu0 %v1535_v3  ;;  %v424_v3 = vld [vmem:[#allocation8 + $0x348] sm:$0xff]  ;;  %v427_v13 = vld [vmem:[#allocation8 + $0x360] sm:$0xff]  ;;  %v1683_v17 = vpack.c.bf16 %v422_v9, %v418_v8  ;;  %v421_v19 = vld [vmem:[#allocation8 + $0x330] sm:$0xff] }
  0xab   :  { %1662 = vmatpush1.bf16.msra.mxu1 %v1661_v18  ;;  %v1559_v11 = vpack.c.bf16 %v428_v4, %v424_v3  ;;  %v436_v16 = vld [vmem:[#allocation8 + $0x3a8] sm:$0xff]  ;;  %v417_v18 = vld [vmem:[#allocation8 + $0x310] sm:$0xff]  ;;  %v426_v20 = vld [vmem:[#allocation8 + $0x358] sm:$0xff]  ;;  %v1561_v22 = vpack.c.bf16 %v427_v13, %v423_v12 }
  0xac   :  { %1664 = vmatprep.subr.bf16.mxu1 %v1663_v21  ;;  %v430_v21 = vld [vmem:[#allocation8 + $0x378] sm:$0xff]  ;;  %v431_v24 = vld [vmem:[#allocation8 + $0x380] sm:$0xff]  ;;  %v425_v28 = vld [vmem:[#allocation8 + $0x350] sm:$0xff] }
  0xad   :  { %1538 = vmatpush1.bf16.msra.mxu0 %v1537_v14  ;;  %v1681_v14 = vpack.c.bf16 %v413_v7, %v409_v6  ;;  %v435_v25 = vld [vmem:[#allocation8 + $0x3a0] sm:$0xff]  ;;  %v429_v29 = vld [vmem:[#allocation8 + $0x370] sm:$0xff]  ;;  %v438_v31 = vld [vmem:[#allocation8 + $0x3b8] sm:$0xff] }
  0xae   :  { %1540 = vmatprep.subr.bf16.mxu0 %v1539_v15  ;;  %v432_v15 = vld [vmem:[#allocation8 + $0x388] sm:$0xff]  ;;  %v1565_v32 = vpack.c.bf16 %v435_v25, %v431_v24  ;;  %v433_v35 = vld [vmem:[#allocation8 + $0x390] sm:$0xff]  ;;  %v442_v40 = vld [vmem:[#allocation8 + $0x3d8] sm:$0xff] }
  0xaf   :  { %1666 = vmatpush1.bf16.msra.mxu1 %v1665_v30  ;;  %v1563_v23 = vpack.c.bf16 %v436_v16, %v432_v15  ;;  %v434_v30 = vld [vmem:[#allocation8 + $0x398] sm:$0xff]  ;;  %v437_v36 = vld [vmem:[#allocation8 + $0x3b0] sm:$0xff]  ;;  %v439_v43 = vld [vmem:[#allocation8 + $0x3c0] sm:$0xff] }
  0xb0   :  { %1668 = vmatprep.subr.bf16.mxu1 %v1667_v33  ;;  %v1689_v33 = vpack.c.bf16 %v429_v29, %v425_v28  ;;  %v1691_v34 = vpack.c.bf16 %v438_v31, %v434_v30  ;;  %v1693_v37 = vpack.c.bf16 %v437_v36, %v433_v35  ;;  %v443_v44 = vld [vmem:[#allocation8 + $0x3e0] sm:$0xff]  ;;  %v441_v47 = vld [vmem:[#allocation8 + $0x3d0] sm:$0xff]  ;;  %v450_v52 = vld [vmem:[#allocation8 + $0x418] sm:$0xff] }
  0xb1   :  { %1542 = vmatpush1.bf16.msra.mxu0 %v1541_v26  ;;  %v1685_v26 = vpack.c.bf16 %v421_v19, %v417_v18  ;;  %v1569_v46 = vpack.c.bf16 %v443_v44, %v439_v43  ;;  %v445_v48 = vld [vmem:[#allocation8 + $0x3f0] sm:$0xff]  ;;  %v2383_v59 = vld [vmem:[#allocation7] sm:$0xf]  ;;  %v447_v0 = vld [vmem:[#allocation8 + $0x400] sm:$0xff] }
  0xb2   :  { %1544 = vmatprep.subr.bf16.mxu0 %v1543_v27  ;;  %v1687_v27 = vpack.c.bf16 %v430_v21, %v426_v20  ;;  %v1697_v49 = vpack.c.bf16 %v445_v48, %v441_v47  ;;  %v451_v1 = vld [vmem:[#allocation8 + $0x420] sm:$0xff]  ;;  %v453_v6 = vld [vmem:[#allocation8 + $0x430] sm:$0xff]  ;;  %v456_v7 = vld [vmem:[#allocation8 + $0x448] sm:$0xff] }
  0xb3   :  { %1670 = vmatpush1.bf16.msra.mxu1 %v1669_v42  ;;  %v446_v42 = vld [vmem:[#allocation8 + $0x3f8] sm:$0xff]  ;;  %v460_v9 = vld [vmem:[#allocation8 + $0x468] sm:$0xff]  ;;  %v1573_v13 = vpack.c.bf16 %v451_v1, %v447_v0  ;;  %v455_v15 = vld [vmem:[#allocation8 + $0x440] sm:$0xff] }
  0xb4   :  { %1672 = vmatprep.subr.bf16.mxu1 %v1671_v45  ;;  %v1695_v45 = vpack.c.bf16 %v446_v42, %v442_v40  ;;  %v459_v16 = vld [vmem:[#allocation8 + $0x460] sm:$0xff]  ;;  %v1575_v19 = vpack.c.bf16 %v460_v9, %v456_v7  ;;  %v457_v21 = vld [vmem:[#allocation8 + $0x450] sm:$0xff]  ;;  %v468_v24 = vld [vmem:[#allocation8 + $0x4a8] sm:$0xff] }
  0xb5   :  { %1546 = vmatpush1.bf16.msra.mxu0 %v1545_v38  ;;  %v440_v38 = vld [vmem:[#allocation8 + $0x3c8] sm:$0xff]  ;;  %v466_v25 = vld [vmem:[#allocation8 + $0x498] sm:$0xff]  ;;  %v1577_v29 = vpack.c.bf16 %v459_v16, %v455_v15  ;;  %v463_v31 = vld [vmem:[#allocation8 + $0x480] sm:$0xff] }
  0xb6   :  { %1548 = vmatprep.subr.bf16.mxu0 %v1547_v39  ;;  %v444_v39 = vld [vmem:[#allocation8 + $0x3e8] sm:$0xff]  ;;  %v465_v36 = vld [vmem:[#allocation8 + $0x490] sm:$0xff]  ;;  %v474_v40 = vld [vmem:[#allocation8 + $0x4d8] sm:$0xff] }
  0xb7   :  { %1674 = vmatpush1.bf16.msra.mxu1 %v1673_v54  ;;  %v1567_v41 = vpack.c.bf16 %v444_v39, %v440_v38  ;;  %v454_v54 = vld [vmem:[#allocation8 + $0x438] sm:$0xff]  ;;  %v472_v38 = vld [vmem:[#allocation8 + $0x4c8] sm:$0xff]  ;;  %v481_v1 = vld [vmem:[#allocation8 + $0x510] sm:$0xff] }
  0xb8   :  { %1676 = vmatprep.subr.bf16.mxu1 %v1675_v57  ;;  %v1699_v55 = vpack.c.bf16 %v454_v54, %v450_v52  ;;  %v2378_v57 = vshrl.u32 %v149_v56, 7  ;;  %v476_v39 = vld [vmem:[#allocation8 + $0x4e8] sm:$0xff]  ;;  %v486_v54 = vld [vmem:[#allocation8 + $0x538] sm:$0xff]  ;;  %v493_v15 = vld [vmem:[#allocation8 + $0x570] sm:$0xff] }
  0xb9   :  { %1550 = vmatpush1.bf16.msra.mxu0 %v1549_v50  ;;  %v448_v50 = vld [vmem:[#allocation8 + $0x408] sm:$0xff]  ;;  %v1583_v47 = vpack.c.bf16 %v476_v39, %v472_v38  ;;  %v494_v7 = vld [vmem:[#allocation8 + $0x578] sm:$0xff]  ;;  %v505_v39 = vld [vmem:[#allocation8 + $0x5d0] sm:$0xff] }
  0xba   :  { %1552 = vmatprep.subr.bf16.mxu0 %v1551_v51  ;;  %v452_v51 = vld [vmem:[#allocation8 + $0x428] sm:$0xff]  ;;  %v2381_v58 = vsub.s32 0, %v2378_v57  ;;  %v2386_v60 = vsub.s32 1, %v2378_v57 }
  0xbb   :  { %1678 = vmatpush1.bf16.msra.mxu1 %v1677_v2  ;;  %v1571_v53 = vpack.c.bf16 %v452_v51, %v448_v50  ;;  %v2393_v2 = vsub.s32 3, %v2378_v57  ;;  %v477_v50 = vld [vmem:[#allocation8 + $0x4f0] sm:$0xff]  ;;  %v480_v51 = vld [vmem:[#allocation8 + $0x508] sm:$0xff] }
  0xbc   :  { %1680 = vmatprep.subr.bf16.mxu1 %v1679_v5  ;;  %v152_v61 = vrot.slane %v2383_v59, %v2381_v58  ;;  %v449_v5 = vld [vmem:[#allocation8 + $0x410] sm:$0xff]  ;;  %v484_v52 = vld [vmem:[#allocation8 + $0x528] sm:$0xff] }
  0xbd   :  { %1554 = vmatpush1.bf16.msra.mxu0 %v1553_v62  ;;  %v156_v62 = vrot.slane %v2383_v59, %v2386_v60  ;;  %v496_v16 = vld [vmem:[#allocation8 + $0x588] sm:$0xff] }
  0xbe   :  { %1556 = vmatprep.subr.bf16.mxu0 %v1555_v63 }
  0xbf   :  { %1682 = vmatpush1.bf16.msra.mxu1 %v1681_v14  ;;  %v1701_v14 = vpack.c.bf16 %v453_v6, %v449_v5  ;;  %v492_v5 = vld [vmem:[#allocation8 + $0x568] sm:$0xff]  ;;  %v490_v6 = vld [vmem:[#allocation8 + $0x558] sm:$0xff] }
  0xc0   :  { %1684 = vmatprep.subr.bf16.mxu1 %v1683_v17  ;;  %v164_v17 = vrot.slane %v2383_v59, %v2393_v2 }
  0xc1   :  { %1558 = vmatpush1.bf16.msra.mxu0 %v1557_v10  ;;  %v458_v10 = vld [vmem:[#allocation8 + $0x458] sm:$0xff] }
  0xc2   :  { %1560 = vmatprep.subr.bf16.mxu0 %v1559_v11  ;;  %v462_v11 = vld [vmem:[#allocation8 + $0x478] sm:$0xff] }
  0xc3   :  { %1686 = vmatpush1.bf16.msra.mxu1 %v1685_v26  ;;  %v1703_v20 = vpack.c.bf16 %v462_v11, %v458_v10  ;;  %v470_v26 = vld [vmem:[#allocation8 + $0x4b8] sm:$0xff]  ;;  %v487_v10 = vld [vmem:[#allocation8 + $0x540] sm:$0xff] }
  0xc4   :  { %1688 = vmatprep.subr.bf16.mxu1 %v1687_v27  ;;  %v1707_v35 = vpack.c.bf16 %v470_v26, %v466_v25  ;;  %v491_v11 = vld [vmem:[#allocation8 + $0x560] sm:$0xff]  ;;  %v497_v26 = vld [vmem:[#allocation8 + $0x590] sm:$0xff] }
  0xc5   :  { %1562 = vmatpush1.bf16.msra.mxu0 %v1561_v22  ;;  %v461_v22 = vld [vmem:[#allocation8 + $0x470] sm:$0xff] }
  0xc6   :  { %1564 = vmatprep.subr.bf16.mxu0 %v1563_v23  ;;  %v464_v23 = vld [vmem:[#allocation8 + $0x488] sm:$0xff]  ;;  %v1705_v30 = vpack.c.bf16 %v461_v22, %v457_v21  ;;  %v495_v22 = vld [vmem:[#allocation8 + $0x580] sm:$0xff] }
  0xc7   :  { %1690 = vmatpush1.bf16.msra.mxu1 %v1689_v33 }
  0xc8   :  { %1692 = vmatprep.subr.bf16.mxu1 %v1691_v34  ;;  %v1579_v34 = vpack.c.bf16 %v468_v24, %v464_v23  ;;  %v499_v23 = vld [vmem:[#allocation8 + $0x5a0] sm:$0xff] }
  0xc9   :  { %1566 = vmatpush1.bf16.msra.mxu0 %v1565_v32  ;;  %v467_v32 = vld [vmem:[#allocation8 + $0x4a0] sm:$0xff] }
  0xca   :  { %1568 = vmatprep.subr.bf16.mxu0 %v1567_v41  ;;  %v478_v41 = vld [vmem:[#allocation8 + $0x4f8] sm:$0xff]  ;;  %v1581_v43 = vpack.c.bf16 %v467_v32, %v463_v31 }
  0xcb   :  { %1694 = vmatpush1.bf16.msra.mxu1 %v1693_v37  ;;  %v469_v37 = vld [vmem:[#allocation8 + $0x4b0] sm:$0xff]  ;;  %v1711_v48 = vpack.c.bf16 %v478_v41, %v474_v40  ;;  %v506_v31 = vld [vmem:[#allocation8 + $0x5d8] sm:$0xff]  ;;  %v512_v41 = vld [vmem:[#allocation8 + $0x608] sm:$0xff] }
  0xcc   :  { %1696 = vmatprep.subr.bf16.mxu1 %v1695_v45  ;;  %v1709_v44 = vpack.c.bf16 %v469_v37, %v465_v36  ;;  %v471_v45 = vld [vmem:[#allocation8 + $0x4c0] sm:$0xff]  ;;  %v510_v32 = vld [vmem:[#allocation8 + $0x5f8] sm:$0xff]  ;;  %v509_v40 = vld [vmem:[#allocation8 + $0x5f0] sm:$0xff] }
  0xcd   :  { %1570 = vmatpush1.bf16.msra.mxu0 %v1569_v46  ;;  %v475_v46 = vld [vmem:[#allocation8 + $0x4e0] sm:$0xff]  ;;  %v1727_v38 = vpack.c.bf16 %v510_v32, %v506_v31  ;;  %v544_v31 = vld [vmem:[#allocation8 + $0x708] sm:$0xff] }
  0xce   :  { %1572 = vmatprep.subr.bf16.mxu0 %v1571_v53  ;;  %v482_v53 = vld [vmem:[#allocation8 + $0x518] sm:$0xff]  ;;  %v507_v36 = vld [vmem:[#allocation8 + $0x5e0] sm:$0xff]  ;;  %v548_v32 = vld [vmem:[#allocation8 + $0x728] sm:$0xff] }
  0xcf   :  { %1698 = vmatpush1.bf16.msra.mxu1 %v1697_v49  ;;  %v473_v49 = vld [vmem:[#allocation8 + $0x4d0] sm:$0xff]  ;;  %v1715_v0 = vpack.c.bf16 %v486_v54, %v482_v53  ;;  %v520_v53 = vld [vmem:[#allocation8 + $0x648] sm:$0xff] }
  0xd0   :  { %1700 = vmatprep.subr.bf16.mxu1 %v1699_v55  ;;  %v1585_v55 = vpack.c.bf16 %v475_v46, %v471_v45  ;;  %v1713_v56 = vpack.c.bf16 %v477_v50, %v473_v49  ;;  %v1729_v46 = vpack.c.bf16 %v509_v40, %v505_v39  ;;  %v524_v54 = vld [vmem:[#allocation8 + $0x668] sm:$0xff]  ;;  %v1619_v39 = vpack.c.bf16 %v548_v32, %v544_v31  ;;  %v887_v32 = vld [vmem:[#allocation11 + $0x10] sm:$0xff] }
 0x163   :  { %v239_v63 = vpop.f32.mrb[0].mxu0 }
 0x164   :  { %v240_v3 = vadd.f32 %v239_v63, %v152_v61  ;;  %v241_v4 = vpop.f32.mrb[1].mxu0  ;;  %v479_v61 = vld [vmem:[#allocation8 + $0x500] sm:$0xff]  ;;  %v1587_v63 = vpack.c.bf16 %v484_v52, %v480_v51  ;;  %v513_v51 = vld [vmem:[#allocation8 + $0x610] sm:$0xff] }
 0x165   :  { %v242_v8 = vadd.f32 %v241_v4, %v156_v62  ;;  %v2397_v27 = vpop.f32.mrb[0].mxu1  ;;  %v483_v62 = vld [vmem:[#allocation8 + $0x520] sm:$0xff]  ;;  %v488_v4 = vld [vmem:[#allocation8 + $0x548] sm:$0xff]  ;;  %v517_v52 = vld [vmem:[#allocation8 + $0x630] sm:$0xff] }
 0x166   :  { %v315_v18 = vmax.f32 %v240_v3, 0.0  ;;  %v312_v28 = vpop.f32.mrb[1].mxu1  ;;  %v485_v3 = vld [vmem:[#allocation8 + $0x530] sm:$0xff] }
 0x167   :  { %v316_v12 = vmax.f32 %v242_v8, 0.0  ;;  %v313_v33 = vadd.f32 %v312_v28, %v164_v17  ;;  %v1589_v8 = vpack.c.bf16 %v483_v62, %v479_v61  ;;  %v1717_v9 = vpack.c.bf16 %v485_v3, %v481_v1  ;;  %v500_v17 = vld [vmem:[#allocation8 + $0x5a8] sm:$0xff]  ;;  %v501_v28 = vld [vmem:[#allocation8 + $0x5b0] sm:$0xff] }
 0x168   :  { %v1595_v24 = vpack.c.bf16 %v500_v17, %v496_v16  ;;  %v1733_v62 = vpack.c.bf16 %v517_v52, %v513_v51  ;;  %v1607_v1 = vpack.c.bf16 %v524_v54, %v520_v53  ;;  %v529_v16 = vld [vmem:[#allocation8 + $0x690] sm:$0xff] }
 0x169   :  { %661 = vmatprep.mubr.f32.mxu0 %v316_v12  ;;  %803 = vmatprep.mubr.f32.mxu1 %v316_v12  ;;  %v318_v42 = vmax.f32 %v313_v33, 0.0  ;;  %v1591_v12 = vpack.c.bf16 %v492_v5, %v488_v4  ;;  %v1597_v33 = vpack.c.bf16 %v499_v23, %v495_v22  ;;  %v521_v4 = vld [vmem:[#allocation8 + $0x650] sm:$0xff] }
 0x16a   :  { %662 = vmatmul.mubr.f32.vlgmr.msra.gmra.mrb[2].mxu0 %v315_v18  ;;  %804 = vmatmul.mubr.f32.vlgmr.msra.gmra.mrb[2].mxu1 %v315_v18  ;;  %v498_v18 = vld [vmem:[#allocation8 + $0x598] sm:$0xff]  ;;  %v525_v5 = vld [vmem:[#allocation8 + $0x670] sm:$0xff] }
 0x16b   :  { %1574 = vmatpush1.bf16.msra.mxu0 %v1573_v13  ;;  %1702 = vmatpush1.bf16.msra.mxu1 %v1701_v14  ;;  %v1719_v13 = vpack.c.bf16 %v494_v7, %v490_v6  ;;  %v489_v14 = vld [vmem:[#allocation8 + $0x550] sm:$0xff]  ;;  %v528_v6 = vld [vmem:[#allocation8 + $0x688] sm:$0xff] }
 0x16c   :  { %1576 = vmatprep.subr.bf16.mxu0 %v1575_v19  ;;  %1704 = vmatprep.subr.bf16.mxu1 %v1703_v20  ;;  %v502_v19 = vld [vmem:[#allocation8 + $0x5b8] sm:$0xff]  ;;  %v1593_v20 = vpack.c.bf16 %v491_v11, %v487_v10  ;;  %v1721_v21 = vpack.c.bf16 %v493_v15, %v489_v14  ;;  %v532_v7 = vld [vmem:[#allocation8 + $0x6a8] sm:$0xff]  ;;  %v1737_v11 = vpack.c.bf16 %v525_v5, %v521_v4  ;;  %v533_v17 = vld [vmem:[#allocation8 + $0x6b0] sm:$0xff]  ;;  %v2400_v4 = vsub.s32 2, %v2378_v57 }
 0x16d   :  { %732 = vmatprep.mubr.f32.mxu0 %v318_v42  ;;  %874 = vmatprep.mubr.f32.mxu1 %v318_v42  ;;  %v1723_v25 = vpack.c.bf16 %v502_v19, %v498_v18  ;;  %v516_v42 = vld [vmem:[#allocation8 + $0x628] sm:$0xff]  ;;  %v1611_v14 = vpack.c.bf16 %v532_v7, %v528_v6  ;;  %v1741_v23 = vpack.c.bf16 %v533_v17, %v529_v16  ;;  %v553_v53 = vld [vmem:[#allocation8 + $0x750] sm:$0xff]  ;;  %v571_v16 = vld [vmem:[#allocation8 + $0x7e0] sm:$0xff] }
 0x16e   :  { %v1603_v49 = vpack.c.bf16 %v516_v42, %v512_v41  ;;  %v536_v18 = vld [vmem:[#allocation8 + $0x6c8] sm:$0xff]  ;;  %v545_v41 = vld [vmem:[#allocation8 + $0x710] sm:$0xff]  ;;  %v160_v17 = vrot.slane %v2383_v59, %v2400_v4 }
 0x16f   :  { %1578 = vmatpush1.bf16.msra.mxu0 %v1577_v29  ;;  %1706 = vmatpush1.bf16.msra.mxu1 %v1705_v30  ;;  %v504_v29 = vld [vmem:[#allocation8 + $0x5c8] sm:$0xff]  ;;  %v549_v42 = vld [vmem:[#allocation8 + $0x730] sm:$0xff] }
 0x170   :  { %1580 = vmatprep.subr.bf16.mxu0 %v1579_v34  ;;  %1708 = vmatprep.subr.bf16.mxu1 %v1707_v35  ;;  %v508_v30 = vld [vmem:[#allocation8 + $0x5e8] sm:$0xff]  ;;  %v1725_v34 = vpack.c.bf16 %v501_v28, %v497_v26  ;;  %v503_v35 = vld [vmem:[#allocation8 + $0x5c0] sm:$0xff]  ;;  %v557_v54 = vld [vmem:[#allocation8 + $0x770] sm:$0xff] }
 0x171   :  { %v1599_v37 = vpack.c.bf16 %v508_v30, %v504_v29  ;;  %v1601_v45 = vpack.c.bf16 %v507_v36, %v503_v35  ;;  %v540_v19 = vld [vmem:[#allocation8 + $0x6e8] sm:$0xff]  ;;  %v537_v29 = vld [vmem:[#allocation8 + $0x6d0] sm:$0xff] }
 0x172   :  { %v1615_v26 = vpack.c.bf16 %v540_v19, %v536_v18  ;;  %v541_v30 = vld [vmem:[#allocation8 + $0x6f0] sm:$0xff] }
 0x173   :  { %1582 = vmatpush1.bf16.msra.mxu0 %v1581_v43  ;;  %1710 = vmatpush1.bf16.msra.mxu1 %v1709_v44  ;;  %v514_v43 = vld [vmem:[#allocation8 + $0x618] sm:$0xff]  ;;  %v1745_v36 = vpack.c.bf16 %v541_v30, %v537_v29  ;;  %v561_v7 = vld [vmem:[#allocation8 + $0x790] sm:$0xff]  ;;  %v889_v29 = vld [vmem:[#allocation11 + $0x20] sm:$0xff]  ;;  %v311_v30 = vadd.f32 %v2397_v27, %v160_v17 }
 0x174   :  { %1584 = vmatprep.subr.bf16.mxu0 %v1583_v47  ;;  %1712 = vmatprep.subr.bf16.mxu1 %v1711_v48  ;;  %v518_v44 = vld [vmem:[#allocation8 + $0x638] sm:$0xff]  ;;  %v511_v47 = vld [vmem:[#allocation8 + $0x600] sm:$0xff]  ;;  %v569_v19 = vld [vmem:[#allocation8 + $0x7d0] sm:$0xff] }
 0x175   :  { %v515_v48 = vld [vmem:[#allocation8 + $0x620] sm:$0xff]  ;;  %v1731_v50 = vpack.c.bf16 %v518_v44, %v514_v43  ;;  %v552_v43 = vld [vmem:[#allocation8 + $0x748] sm:$0xff] }
 0x176   :  { %v1605_v61 = vpack.c.bf16 %v515_v48, %v511_v47  ;;  %v556_v44 = vld [vmem:[#allocation8 + $0x768] sm:$0xff]  ;;  %v1749_v48 = vpack.c.bf16 %v549_v42, %v545_v41  ;;  %v317_v42 = vmax.f32 %v311_v30, 0.0 }
 0x177   :  { %1586 = vmatpush1.bf16.msra.mxu0 %v1585_v55  ;;  %1714 = vmatpush1.bf16.msra.mxu1 %v1713_v56  ;;  %v522_v55 = vld [vmem:[#allocation8 + $0x658] sm:$0xff]  ;;  %v1623_v51 = vpack.c.bf16 %v556_v44, %v552_v43  ;;  %v897_v41 = vld [vmem:[#allocation11 + $0x60] sm:$0xff] }
 0x178   :  { %1588 = vmatprep.subr.bf16.mxu0 %v1587_v63  ;;  %1716 = vmatprep.subr.bf16.mxu1 %v1715_v0  ;;  %v526_v56 = vld [vmem:[#allocation8 + $0x678] sm:$0xff]  ;;  %v519_v63 = vld [vmem:[#allocation8 + $0x640] sm:$0xff] }
 0x179   :  { %v523_v0 = vld [vmem:[#allocation8 + $0x660] sm:$0xff]  ;;  %v1735_v3 = vpack.c.bf16 %v526_v56, %v522_v55  ;;  %v560_v55 = vld [vmem:[#allocation8 + $0x788] sm:$0xff]  ;;  %v895_v44 = vld [vmem:[#allocation11 + $0x50] sm:$0xff] }
 0x17a   :  { %v1609_v10 = vpack.c.bf16 %v523_v0, %v519_v63  ;;  %v564_v56 = vld [vmem:[#allocation8 + $0x7a8] sm:$0xff]  ;;  %v1753_v0 = vpack.c.bf16 %v557_v54, %v553_v53 }
 0x17b   :  { %1590 = vmatpush1.bf16.msra.mxu0 %v1589_v8  ;;  %1718 = vmatpush1.bf16.msra.mxu1 %v1717_v9  ;;  %v530_v8 = vld [vmem:[#allocation8 + $0x698] sm:$0xff]  ;;  %v1627_v5 = vpack.c.bf16 %v564_v56, %v560_v55  ;;  %v905_v53 = vld [vmem:[#allocation11 + $0xa0] sm:$0xff] }
 0x17c   :  { %1592 = vmatprep.subr.bf16.mxu0 %v1591_v12  ;;  %1720 = vmatprep.subr.bf16.mxu1 %v1719_v13  ;;  %v534_v9 = vld [vmem:[#allocation8 + $0x6b8] sm:$0xff]  ;;  %v527_v12 = vld [vmem:[#allocation8 + $0x680] sm:$0xff] }
 0x17d   :  { %v531_v13 = vld [vmem:[#allocation8 + $0x6a0] sm:$0xff]  ;;  %v1739_v15 = vpack.c.bf16 %v534_v9, %v530_v8  ;;  %v565_v8 = vld [vmem:[#allocation8 + $0x7b0] sm:$0xff]  ;;  %v568_v9 = vld [vmem:[#allocation8 + $0x7c8] sm:$0xff] }
 0x17e   :  { %v1613_v22 = vpack.c.bf16 %v531_v13, %v527_v12  ;;  %v574_v12 = vld [vmem:[#allocation8 + $0x7f8] sm:$0xff]  ;;  %v925_v30 = vld [vmem:[#allocation11 + $0x140] sm:$0xff] }
 0x17f   :  { %1594 = vmatpush1.bf16.msra.mxu0 %v1593_v20  ;;  %1722 = vmatpush1.bf16.msra.mxu1 %v1721_v21  ;;  %v538_v20 = vld [vmem:[#allocation8 + $0x6d8] sm:$0xff] }
 0x180   :  { %1596 = vmatprep.subr.bf16.mxu0 %v1595_v24  ;;  %1724 = vmatprep.subr.bf16.mxu1 %v1723_v25  ;;  %v542_v21 = vld [vmem:[#allocation8 + $0x6f8] sm:$0xff]  ;;  %v535_v24 = vld [vmem:[#allocation8 + $0x6c0] sm:$0xff] }
 0x181   :  { %v539_v25 = vld [vmem:[#allocation8 + $0x6e0] sm:$0xff]  ;;  %v1743_v28 = vpack.c.bf16 %v542_v21, %v538_v20  ;;  %v573_v20 = vld [vmem:[#allocation8 + $0x7f0] sm:$0xff] }
 0x182   :  { %v1617_v35 = vpack.c.bf16 %v539_v25, %v535_v24  ;;  %v886_v21 = vld [vmem:[#allocation11 + $0x8] sm:$0xff]  ;;  %v892_v24 = vld [vmem:[#allocation11 + $0x38] sm:$0xff]  ;;  %v903_v56 = vld [vmem:[#allocation11 + $0x90] sm:$0xff] }
 0x183   :  { %1598 = vmatpush1.bf16.msra.mxu0 %v1597_v33  ;;  %1726 = vmatpush1.bf16.msra.mxu1 %v1725_v34  ;;  %v546_v33 = vld [vmem:[#allocation8 + $0x718] sm:$0xff] }
 0x184   :  { %1600 = vmatprep.subr.bf16.mxu0 %v1599_v37  ;;  %1728 = vmatprep.subr.bf16.mxu1 %v1727_v38  ;;  %v550_v34 = vld [vmem:[#allocation8 + $0x738] sm:$0xff]  ;;  %v543_v37 = vld [vmem:[#allocation8 + $0x700] sm:$0xff] }
 0x185   :  { %v547_v38 = vld [vmem:[#allocation8 + $0x720] sm:$0xff]  ;;  %v1747_v40 = vpack.c.bf16 %v550_v34, %v546_v33  ;;  %v891_v33 = vld [vmem:[#allocation11 + $0x30] sm:$0xff]  ;;  %v894_v34 = vld [vmem:[#allocation11 + $0x48] sm:$0xff] }
 0x186   :  { %v1621_v47 = vpack.c.bf16 %v547_v38, %v543_v37  ;;  %v900_v37 = vld [vmem:[#allocation11 + $0x78] sm:$0xff] }
 0x187   :  { %1602 = vmatpush1.bf16.msra.mxu0 %v1601_v45  ;;  %1730 = vmatpush1.bf16.msra.mxu1 %v1729_v46  ;;  %v554_v45 = vld [vmem:[#allocation8 + $0x758] sm:$0xff] }
 0x188   :  { %1604 = vmatprep.subr.bf16.mxu0 %v1603_v49  ;;  %1732 = vmatprep.subr.bf16.mxu1 %v1731_v50  ;;  %v558_v46 = vld [vmem:[#allocation8 + $0x778] sm:$0xff]  ;;  %v551_v49 = vld [vmem:[#allocation8 + $0x740] sm:$0xff] }
 0x189   :  { %v555_v50 = vld [vmem:[#allocation8 + $0x760] sm:$0xff]  ;;  %v1751_v52 = vpack.c.bf16 %v558_v46, %v554_v45  ;;  %v899_v45 = vld [vmem:[#allocation11 + $0x70] sm:$0xff]  ;;  %v902_v46 = vld [vmem:[#allocation11 + $0x88] sm:$0xff] }
 0x18a   :  { %v1625_v63 = vpack.c.bf16 %v555_v50, %v551_v49  ;;  %v908_v49 = vld [vmem:[#allocation11 + $0xb8] sm:$0xff] }
 0x18b   :  { %1606 = vmatpush1.bf16.msra.mxu0 %v1605_v61  ;;  %1734 = vmatpush1.bf16.msra.mxu1 %v1733_v62  ;;  %v562_v61 = vld [vmem:[#allocation8 + $0x798] sm:$0xff] }
 0x18c   :  { %1608 = vmatprep.subr.bf16.mxu0 %v1607_v1  ;;  %1736 = vmatprep.subr.bf16.mxu1 %v1735_v3  ;;  %v566_v62 = vld [vmem:[#allocation8 + $0x7b8] sm:$0xff]  ;;  %v559_v1 = vld [vmem:[#allocation8 + $0x780] sm:$0xff] }
 0x18d   :  { %v563_v3 = vld [vmem:[#allocation8 + $0x7a0] sm:$0xff]  ;;  %v1755_v6 = vpack.c.bf16 %v566_v62, %v562_v61  ;;  %v907_v61 = vld [vmem:[#allocation11 + $0xb0] sm:$0xff]  ;;  %v910_v62 = vld [vmem:[#allocation11 + $0xc8] sm:$0xff] }
 0x18e   :  { %v1629_v13 = vpack.c.bf16 %v563_v3, %v559_v1  ;;  %v916_v1 = vld [vmem:[#allocation11 + $0xf8] sm:$0xff] }
 0x18f   :  { %1610 = vmatpush1.bf16.msra.mxu0 %v1609_v10  ;;  %1738 = vmatpush1.bf16.msra.mxu1 %v1737_v11  ;;  %v572_v10 = vld [vmem:[#allocation8 + $0x7e8] sm:$0xff]  ;;  %v570_v11 = vld [vmem:[#allocation8 + $0x7d8] sm:$0xff] }
 0x190   :  { %1612 = vmatprep.subr.bf16.mxu0 %v1611_v14  ;;  %1740 = vmatprep.subr.bf16.mxu1 %v1739_v15  ;;  %v1757_v14 = vpack.c.bf16 %v565_v8, %v561_v7  ;;  %v567_v15 = vld [vmem:[#allocation8 + $0x7c0] sm:$0xff]  ;;  %v1631_v57 = vpack.c.bf16 %v572_v10, %v568_v9  ;;  %v1759_v18 = vpack.c.bf16 %v574_v12, %v570_v11  ;;  %v911_v10 = vld [vmem:[#allocation11 + $0xd0] sm:$0xff]  ;;  %v918_v12 = vld [vmem:[#allocation11 + $0x108] sm:$0xff] }
 0x191   :  { %v1633_v25 = vpack.c.bf16 %v571_v16, %v567_v15  ;;  %v913_v7 = vld [vmem:[#allocation11 + $0xe0] sm:$0xff]  ;;  %v915_v11 = vld [vmem:[#allocation11 + $0xf0] sm:$0xff]  ;;  %v924_v15 = vld [vmem:[#allocation11 + $0x138] sm:$0xff] }
 0x192   :  { %v1905_v17 = vpack.c.bf16 %v915_v11, %v911_v10  ;;  %v951_v10 = vld [vmem:[#allocation11 + $0x210] sm:$0xff] }
 0x193   :  { %1614 = vmatpush1.bf16.msra.mxu0 %v1613_v22  ;;  %1742 = vmatpush1.bf16.msra.mxu1 %v1741_v23  ;;  %v890_v22 = vld [vmem:[#allocation11 + $0x28] sm:$0xff]  ;;  %v888_v23 = vld [vmem:[#allocation11 + $0x18] sm:$0xff]  ;;  %v955_v11 = vld [vmem:[#allocation11 + $0x230] sm:$0xff] }
 0x194   :  { %1616 = vmatprep.subr.bf16.mxu0 %v1615_v26  ;;  %1744 = vmatprep.subr.bf16.mxu1 %v1743_v28  ;;  %v1761_v26 = vpack.c.bf16 %v573_v20, %v569_v19  ;;  %v885_v28 = vld [vmem:[#allocation11] sm:$0xff]  ;;  %v1763_v59 = vpack.c.bf16 %v890_v22, %v886_v21  ;;  %v1891_v31 = vpack.c.bf16 %v892_v24, %v888_v23  ;;  %v919_v21 = vld [vmem:[#allocation11 + $0x110] sm:$0xff]  ;;  %v926_v23 = vld [vmem:[#allocation11 + $0x148] sm:$0xff] }
 0x195   :  { %v1765_v38 = vpack.c.bf16 %v889_v29, %v885_v28  ;;  %v923_v22 = vld [vmem:[#allocation11 + $0x130] sm:$0xff]  ;;  %v930_v24 = vld [vmem:[#allocation11 + $0x168] sm:$0xff] }
 0x196   :  { %v1909_v29 = vpack.c.bf16 %v923_v22, %v919_v21  ;;  %v959_v21 = vld [vmem:[#allocation11 + $0x250] sm:$0xff] }
 0x197   :  { %1618 = vmatpush1.bf16.msra.mxu0 %v1617_v35  ;;  %1746 = vmatpush1.bf16.msra.mxu1 %v1745_v36  ;;  %v898_v35 = vld [vmem:[#allocation11 + $0x68] sm:$0xff]  ;;  %v896_v36 = vld [vmem:[#allocation11 + $0x58] sm:$0xff]  ;;  %v963_v22 = vld [vmem:[#allocation11 + $0x270] sm:$0xff] }
 0x198   :  { %1620 = vmatprep.subr.bf16.mxu0 %v1619_v39  ;;  %1748 = vmatprep.subr.bf16.mxu1 %v1747_v40  ;;  %v1893_v39 = vpack.c.bf16 %v891_v33, %v887_v32  ;;  %v893_v40 = vld [vmem:[#allocation11 + $0x40] sm:$0xff]  ;;  %v1767_v27 = vpack.c.bf16 %v898_v35, %v894_v34  ;;  %v1895_v43 = vpack.c.bf16 %v900_v37, %v896_v36  ;;  %v927_v33 = vld [vmem:[#allocation11 + $0x150] sm:$0xff]  ;;  %v934_v35 = vld [vmem:[#allocation11 + $0x188] sm:$0xff] }
 0x199   :  { %v1769_v50 = vpack.c.bf16 %v897_v41, %v893_v40  ;;  %v931_v34 = vld [vmem:[#allocation11 + $0x170] sm:$0xff]  ;;  %v938_v36 = vld [vmem:[#allocation11 + $0x1a8] sm:$0xff]  ;;  %v936_v37 = vld [vmem:[#allocation11 + $0x198] sm:$0xff] }
 0x19a   :  { %v1913_v40 = vpack.c.bf16 %v931_v34, %v927_v33  ;;  %v933_v41 = vld [vmem:[#allocation11 + $0x180] sm:$0xff]  ;;  %v967_v33 = vld [vmem:[#allocation11 + $0x290] sm:$0xff] }
 0x19b   :  { %1622 = vmatpush1.bf16.msra.mxu0 %v1621_v47  ;;  %1750 = vmatpush1.bf16.msra.mxu1 %v1749_v48  ;;  %v906_v47 = vld [vmem:[#allocation11 + $0xa8] sm:$0xff]  ;;  %v904_v48 = vld [vmem:[#allocation11 + $0x98] sm:$0xff]  ;;  %v971_v34 = vld [vmem:[#allocation11 + $0x2b0] sm:$0xff] }
 0x19c   :  { %1624 = vmatprep.subr.bf16.mxu0 %v1623_v51  ;;  %1752 = vmatprep.subr.bf16.mxu1 %v1751_v52  ;;  %v1897_v51 = vpack.c.bf16 %v899_v45, %v895_v44  ;;  %v901_v52 = vld [vmem:[#allocation11 + $0x80] sm:$0xff]  ;;  %v1771_v54 = vpack.c.bf16 %v906_v47, %v902_v46  ;;  %v1899_v55 = vpack.c.bf16 %v908_v49, %v904_v48  ;;  %v935_v44 = vld [vmem:[#allocation11 + $0x190] sm:$0xff]  ;;  %v942_v46 = vld [vmem:[#allocation11 + $0x1c8] sm:$0xff] }
 0x19d   :  { %v1773_v3 = vpack.c.bf16 %v905_v53, %v901_v52  ;;  %v939_v45 = vld [vmem:[#allocation11 + $0x1b0] sm:$0xff]  ;;  %v946_v47 = vld [vmem:[#allocation11 + $0x1e8] sm:$0xff]  ;;  %v944_v48 = vld [vmem:[#allocation11 + $0x1d8] sm:$0xff] }
 0x19e   :  { %v948_v49 = vld [vmem:[#allocation11 + $0x1f8] sm:$0xff]  ;;  %v941_v52 = vld [vmem:[#allocation11 + $0x1c0] sm:$0xff] }
 0x19f   :  { %1626 = vmatpush1.bf16.msra.mxu0 %v1625_v63  ;;  %1754 = vmatpush1.bf16.msra.mxu1 %v1753_v0  ;;  %v914_v63 = vld [vmem:[#allocation11 + $0xe8] sm:$0xff]  ;;  %v912_v0 = vld [vmem:[#allocation11 + $0xd8] sm:$0xff]  ;;  %v945_v53 = vld [vmem:[#allocation11 + $0x1e0] sm:$0xff] }
 0x1a0   :  { %1628 = vmatprep.subr.bf16.mxu0 %v1627_v5  ;;  %1756 = vmatprep.subr.bf16.mxu1 %v1755_v6  ;;  %v1901_v5 = vpack.c.bf16 %v907_v61, %v903_v56  ;;  %v909_v6 = vld [vmem:[#allocation11 + $0xc0] sm:$0xff]  ;;  %v1775_v8 = vpack.c.bf16 %v914_v63, %v910_v62  ;;  %v1903_v9 = vpack.c.bf16 %v916_v1, %v912_v0  ;;  %v943_v56 = vld [vmem:[#allocation11 + $0x1d0] sm:$0xff]  ;;  %v950_v62 = vld [vmem:[#allocation11 + $0x208] sm:$0xff] }
 0x1a1   :  { %v1777_v16 = vpack.c.bf16 %v913_v7, %v909_v6  ;;  %v947_v61 = vld [vmem:[#allocation11 + $0x1f0] sm:$0xff]  ;;  %v954_v63 = vld [vmem:[#allocation11 + $0x228] sm:$0xff]  ;;  %v952_v0 = vld [vmem:[#allocation11 + $0x218] sm:$0xff] }
 0x1a2   :  { %v956_v1 = vld [vmem:[#allocation11 + $0x238] sm:$0xff]  ;;  %v949_v6 = vld [vmem:[#allocation11 + $0x200] sm:$0xff] }
 0x1a3   :  { %1630 = vmatpush1.bf16.msra.mxu0 %v1629_v13  ;;  %1758 = vmatpush1.bf16.msra.mxu1 %v1757_v14  ;;  %v922_v13 = vld [vmem:[#allocation11 + $0x128] sm:$0xff]  ;;  %v920_v14 = vld [vmem:[#allocation11 + $0x118] sm:$0xff]  ;;  %v953_v7 = vld [vmem:[#allocation11 + $0x220] sm:$0xff] }
 0x1a4   :  { %1632 = vmatprep.subr.bf16.mxu0 %v1631_v57  ;;  %1760 = vmatprep.subr.bf16.mxu1 %v1759_v18  ;;  %v917_v57 = vld [vmem:[#allocation11 + $0x100] sm:$0xff]  ;;  %v1779_v19 = vpack.c.bf16 %v922_v13, %v918_v12  ;;  %v1907_v20 = vpack.c.bf16 %v924_v15, %v920_v14  ;;  %v958_v12 = vld [vmem:[#allocation11 + $0x248] sm:$0xff]  ;;  %v960_v14 = vld [vmem:[#allocation11 + $0x258] sm:$0xff] }
 0x1a5   :  { %v921_v18 = vld [vmem:[#allocation11 + $0x120] sm:$0xff]  ;;  %v962_v13 = vld [vmem:[#allocation11 + $0x268] sm:$0xff]  ;;  %v964_v15 = vld [vmem:[#allocation11 + $0x278] sm:$0xff] }
 0x1a6   :  { %v1781_v28 = vpack.c.bf16 %v921_v18, %v917_v57  ;;  %v957_v57 = vld [vmem:[#allocation11 + $0x240] sm:$0xff] }
 0x1a7   :  { %1634 = vmatpush1.bf16.msra.mxu0 %v1633_v25  ;;  %1762 = vmatpush1.bf16.msra.mxu1 %v1761_v26  ;;  %v928_v25 = vld [vmem:[#allocation11 + $0x158] sm:$0xff]  ;;  %v961_v18 = vld [vmem:[#allocation11 + $0x260] sm:$0xff] }
 0x1a8   :  { %1764 = vmatprep.subr.bf16.mxu0 %v1763_v59  ;;  %1892 = vmatprep.subr.bf16.mxu1 %v1891_v31  ;;  %v932_v26 = vld [vmem:[#allocation11 + $0x178] sm:$0xff]  ;;  %v929_v59 = vld [vmem:[#allocation11 + $0x160] sm:$0xff]  ;;  %v1783_v31 = vpack.c.bf16 %v930_v24, %v926_v23  ;;  %v966_v23 = vld [vmem:[#allocation11 + $0x288] sm:$0xff] }
 0x1a9   :  { %v1911_v32 = vpack.c.bf16 %v932_v26, %v928_v25  ;;  %v970_v24 = vld [vmem:[#allocation11 + $0x2a8] sm:$0xff]  ;;  %v968_v25 = vld [vmem:[#allocation11 + $0x298] sm:$0xff] }
 0x1aa   :  { %733 = vmatmul.mubr.f32.vlgmr.msra.gmra.mrb[2].mxu0 %v317_v42  ;;  %875 = vmatmul.mubr.f32.vlgmr.msra.gmra.mrb[2].mxu1 %v317_v42  ;;  %v937_v42 = vld [vmem:[#allocation11 + $0x1a0] sm:$0xff]  ;;  %v972_v26 = vld [vmem:[#allocation11 + $0x2b8] sm:$0xff] }
 0x1ab   :  { %1766 = vmatpush1.bf16.msra.mxu0 %v1765_v38  ;;  %1894 = vmatpush1.bf16.msra.mxu1 %v1893_v39  ;;  %v940_v38 = vld [vmem:[#allocation11 + $0x1b8] sm:$0xff]  ;;  %v1785_v39 = vpack.c.bf16 %v929_v59, %v925_v30  ;;  %v965_v30 = vld [vmem:[#allocation11 + $0x280] sm:$0xff] }
 0x1ac   :  { %1768 = vmatprep.subr.bf16.mxu0 %v1767_v27  ;;  %1896 = vmatprep.subr.bf16.mxu1 %v1895_v43  ;;  %v1787_v27 = vpack.c.bf16 %v938_v36, %v934_v35  ;;  %v1915_v43 = vpack.c.bf16 %v940_v38, %v936_v37  ;;  %v969_v59 = vld [vmem:[#allocation11 + $0x2a0] sm:$0xff]  ;;  %v974_v35 = vld [vmem:[#allocation11 + $0x2c8] sm:$0xff]  ;;  %v976_v37 = vld [vmem:[#allocation11 + $0x2d8] sm:$0xff] }
 0x1ad   :  { %v978_v36 = vld [vmem:[#allocation11 + $0x2e8] sm:$0xff]  ;;  %v980_v38 = vld [vmem:[#allocation11 + $0x2f8] sm:$0xff] }
 0x1af   :  { %1770 = vmatpush1.bf16.msra.mxu0 %v1769_v50  ;;  %1898 = vmatpush1.bf16.msra.mxu1 %v1897_v51  ;;  %v1789_v50 = vpack.c.bf16 %v937_v42, %v933_v41  ;;  %v1917_v51 = vpack.c.bf16 %v939_v45, %v935_v44  ;;  %v973_v41 = vld [vmem:[#allocation11 + $0x2c0] sm:$0xff]  ;;  %v975_v44 = vld [vmem:[#allocation11 + $0x2d0] sm:$0xff] }
 0x1b0   :  { %1772 = vmatprep.subr.bf16.mxu0 %v1771_v54  ;;  %1900 = vmatprep.subr.bf16.mxu1 %v1899_v55  ;;  %v1791_v54 = vpack.c.bf16 %v946_v47, %v942_v46  ;;  %v1919_v55 = vpack.c.bf16 %v948_v49, %v944_v48  ;;  %v977_v42 = vld [vmem:[#allocation11 + $0x2e0] sm:$0xff]  ;;  %v979_v45 = vld [vmem:[#allocation11 + $0x2f0] sm:$0xff]  ;;  %v982_v46 = vld [vmem:[#allocation11 + $0x308] sm:$0xff] }
 0x1b1   :  { %v986_v47 = vld [vmem:[#allocation11 + $0x328] sm:$0xff]  ;;  %v984_v48 = vld [vmem:[#allocation11 + $0x318] sm:$0xff] }
 0x1b2   :  { %v988_v49 = vld [vmem:[#allocation11 + $0x338] sm:$0xff] }
 0x1b3   :  { %1774 = vmatpush1.bf16.msra.mxu0 %v1773_v3  ;;  %1902 = vmatpush1.bf16.msra.mxu1 %v1901_v5  ;;  %v1793_v3 = vpack.c.bf16 %v945_v53, %v941_v52  ;;  %v1921_v5 = vpack.c.bf16 %v947_v61, %v943_v56  ;;  %v981_v52 = vld [vmem:[#allocation11 + $0x300] sm:$0xff]  ;;  %v983_v56 = vld [vmem:[#allocation11 + $0x310] sm:$0xff] }
 0x1b4   :  { %1776 = vmatprep.subr.bf16.mxu0 %v1775_v8  ;;  %1904 = vmatprep.subr.bf16.mxu1 %v1903_v9  ;;  %v1795_v8 = vpack.c.bf16 %v954_v63, %v950_v62  ;;  %v1923_v9 = vpack.c.bf16 %v956_v1, %v952_v0  ;;  %v985_v53 = vld [vmem:[#allocation11 + $0x320] sm:$0xff]  ;;  %v987_v61 = vld [vmem:[#allocation11 + $0x330] sm:$0xff]  ;;  %v990_v62 = vld [vmem:[#allocation11 + $0x348] sm:$0xff] }
 0x1b5   :  { %v994_v63 = vld [vmem:[#allocation11 + $0x368] sm:$0xff]  ;;  %v992_v0 = vld [vmem:[#allocation11 + $0x358] sm:$0xff] }
 0x1b6   :  { %v996_v1 = vld [vmem:[#allocation11 + $0x378] sm:$0xff] }
 0x1b7   :  { %1778 = vmatpush1.bf16.msra.mxu0 %v1777_v16  ;;  %1906 = vmatpush1.bf16.msra.mxu1 %v1905_v17  ;;  %v1797_v16 = vpack.c.bf16 %v953_v7, %v949_v6  ;;  %v1925_v17 = vpack.c.bf16 %v955_v11, %v951_v10  ;;  %v989_v6 = vld [vmem:[#allocation11 + $0x340] sm:$0xff]  ;;  %v991_v10 = vld [vmem:[#allocation11 + $0x350] sm:$0xff] }
 0x1b8   :  { %1780 = vmatprep.subr.bf16.mxu0 %v1779_v19  ;;  %1908 = vmatprep.subr.bf16.mxu1 %v1907_v20  ;;  %v1799_v19 = vpack.c.bf16 %v962_v13, %v958_v12  ;;  %v1927_v20 = vpack.c.bf16 %v964_v15, %v960_v14  ;;  %v993_v7 = vld [vmem:[#allocation11 + $0x360] sm:$0xff]  ;;  %v995_v11 = vld [vmem:[#allocation11 + $0x370] sm:$0xff]  ;;  %v998_v12 = vld [vmem:[#allocation11 + $0x388] sm:$0xff] }
 0x1b9   :  { %v1002_v13 = vld [vmem:[#allocation11 + $0x3a8] sm:$0xff]  ;;  %v1000_v14 = vld [vmem:[#allocation11 + $0x398] sm:$0xff] }
 0x1ba   :  { %v1004_v15 = vld [vmem:[#allocation11 + $0x3b8] sm:$0xff] }
 0x1bb   :  { %1782 = vmatpush1.bf16.msra.mxu0 %v1781_v28  ;;  %1910 = vmatpush1.bf16.msra.mxu1 %v1909_v29  ;;  %v1801_v28 = vpack.c.bf16 %v961_v18, %v957_v57  ;;  %v1929_v29 = vpack.c.bf16 %v963_v22, %v959_v21  ;;  %v997_v57 = vld [vmem:[#allocation11 + $0x380] sm:$0xff]  ;;  %v1819_v18 = vpack.c.bf16 %v1002_v13, %v998_v12  ;;  %v999_v21 = vld [vmem:[#allocation11 + $0x390] sm:$0xff] }
 0x1bc   :  { %1784 = vmatprep.subr.bf16.mxu0 %v1783_v31  ;;  %1912 = vmatprep.subr.bf16.mxu1 %v1911_v32  ;;  %v1803_v31 = vpack.c.bf16 %v970_v24, %v966_v23  ;;  %v1931_v32 = vpack.c.bf16 %v972_v26, %v968_v25  ;;  %v1003_v22 = vld [vmem:[#allocation11 + $0x3b0] sm:$0xff]  ;;  %v1006_v25 = vld [vmem:[#allocation11 + $0x3c8] sm:$0xff] }
 0x1bd   :  { %v1949_v24 = vpack.c.bf16 %v1003_v22, %v999_v21  ;;  %v1010_v26 = vld [vmem:[#allocation11 + $0x3e8] sm:$0xff] }
 0x1bf   :  { %1786 = vmatpush1.bf16.msra.mxu0 %v1785_v39  ;;  %1914 = vmatpush1.bf16.msra.mxu1 %v1913_v40  ;;  %v1805_v39 = vpack.c.bf16 %v969_v59, %v965_v30  ;;  %v1933_v40 = vpack.c.bf16 %v971_v34, %v967_v33  ;;  %v1012_v30 = vld [vmem:[#allocation11 + $0x3f8] sm:$0xff]  ;;  %v1005_v59 = vld [vmem:[#allocation11 + $0x3c0] sm:$0xff]  ;;  %v1007_v34 = vld [vmem:[#allocation11 + $0x3d0] sm:$0xff] }
 0x1c0   :  { %1788 = vmatprep.subr.bf16.mxu0 %v1787_v27  ;;  %1916 = vmatprep.subr.bf16.mxu1 %v1915_v43  ;;  %v1807_v27 = vpack.c.bf16 %v978_v36, %v974_v35  ;;  %v1935_v43 = vpack.c.bf16 %v980_v38, %v976_v37  ;;  %v1011_v35 = vld [vmem:[#allocation11 + $0x3f0] sm:$0xff]  ;;  %v1014_v37 = vld [vmem:[#allocation11 + $0x408] sm:$0xff] }
 0x1c1   :  { %v1953_v36 = vpack.c.bf16 %v1011_v35, %v1007_v34  ;;  %v1018_v38 = vld [vmem:[#allocation11 + $0x428] sm:$0xff]  ;;  %v1039_v35 = vld [vmem:[#allocation11 + $0x4d0] sm:$0xff] }
 0x1c3   :  { %1790 = vmatpush1.bf16.msra.mxu0 %v1789_v50  ;;  %1918 = vmatpush1.bf16.msra.mxu1 %v1917_v51  ;;  %v1809_v50 = vpack.c.bf16 %v977_v42, %v973_v41  ;;  %v1937_v51 = vpack.c.bf16 %v979_v45, %v975_v44  ;;  %v1020_v41 = vld [vmem:[#allocation11 + $0x438] sm:$0xff] }
 0x1c4   :  { %1792 = vmatprep.subr.bf16.mxu0 %v1791_v54  ;;  %1920 = vmatprep.subr.bf16.mxu1 %v1919_v55  ;;  %v1811_v54 = vpack.c.bf16 %v986_v47, %v982_v46  ;;  %v1939_v55 = vpack.c.bf16 %v988_v49, %v984_v48  ;;  %v1013_v48 = vld [vmem:[#allocation11 + $0x400] sm:$0xff] }
 0x1c7   :  { %1794 = vmatpush1.bf16.msra.mxu0 %v1793_v3  ;;  %1922 = vmatpush1.bf16.msra.mxu1 %v1921_v5  ;;  %v1813_v3 = vpack.c.bf16 %v985_v53, %v981_v52  ;;  %v1941_v5 = vpack.c.bf16 %v987_v61, %v983_v56  ;;  %v1017_v52 = vld [vmem:[#allocation11 + $0x420] sm:$0xff]  ;;  %v1015_v53 = vld [vmem:[#allocation11 + $0x410] sm:$0xff]  ;;  %v1022_v56 = vld [vmem:[#allocation11 + $0x448] sm:$0xff] }
 0x1c8   :  { %1796 = vmatprep.subr.bf16.mxu0 %v1795_v8  ;;  %1924 = vmatprep.subr.bf16.mxu1 %v1923_v9  ;;  %v1815_v8 = vpack.c.bf16 %v994_v63, %v990_v62  ;;  %v1943_v9 = vpack.c.bf16 %v996_v1, %v992_v0  ;;  %v1026_v62 = vld [vmem:[#allocation11 + $0x468] sm:$0xff]  ;;  %v1024_v63 = vld [vmem:[#allocation11 + $0x458] sm:$0xff] }
 0x1c9   :  { %v1028_v0 = vld [vmem:[#allocation11 + $0x478] sm:$0xff]  ;;  %v1831_v12 = vpack.c.bf16 %v1026_v62, %v1022_v56  ;;  %v1053_v56 = vld [vmem:[#allocation11 + $0x540] sm:$0xff] }
 0x1ca   :  { %v1959_v13 = vpack.c.bf16 %v1028_v0, %v1024_v63  ;;  %v1055_v0 = vld [vmem:[#allocation11 + $0x550] sm:$0xff] }
 0x1cb   :  { %1798 = vmatpush1.bf16.msra.mxu0 %v1797_v16  ;;  %1926 = vmatpush1.bf16.msra.mxu1 %v1925_v17  ;;  %v1817_v16 = vpack.c.bf16 %v993_v7, %v989_v6  ;;  %v1945_v17 = vpack.c.bf16 %v995_v11, %v991_v10  ;;  %v1021_v6 = vld [vmem:[#allocation11 + $0x440] sm:$0xff]  ;;  %v1027_v10 = vld [vmem:[#allocation11 + $0x470] sm:$0xff]  ;;  %v1030_v11 = vld [vmem:[#allocation11 + $0x488] sm:$0xff] }
 0x1cc   :  { %1800 = vmatprep.subr.bf16.mxu0 %v1799_v19  ;;  %1928 = vmatprep.subr.bf16.mxu1 %v1927_v20  ;;  %v1947_v19 = vpack.c.bf16 %v1004_v15, %v1000_v14  ;;  %v1001_v20 = vld [vmem:[#allocation11 + $0x3a0] sm:$0xff]  ;;  %v1034_v14 = vld [vmem:[#allocation11 + $0x4a8] sm:$0xff]  ;;  %v1032_v15 = vld [vmem:[#allocation11 + $0x498] sm:$0xff] }
 0x1cd   :  { %v1821_v23 = vpack.c.bf16 %v1001_v20, %v997_v57  ;;  %v1025_v7 = vld [vmem:[#allocation11 + $0x460] sm:$0xff]  ;;  %v1835_v21 = vpack.c.bf16 %v1034_v14, %v1030_v11  ;;  %v1063_v14 = vld [vmem:[#allocation11 + $0x590] sm:$0xff] }
 0x1ce   :  { %v1833_v57 = vpack.c.bf16 %v1025_v7, %v1021_v6  ;;  %v1033_v20 = vld [vmem:[#allocation11 + $0x4a0] sm:$0xff]  ;;  %v1064_v6 = vld [vmem:[#allocation11 + $0x598] sm:$0xff] }
 0x1cf   :  { %1802 = vmatpush1.bf16.msra.mxu0 %v1801_v28  ;;  %1930 = vmatpush1.bf16.msra.mxu1 %v1929_v29  ;;  %v1008_v28 = vld [vmem:[#allocation11 + $0x3d8] sm:$0xff]  ;;  %v1823_v29 = vpack.c.bf16 %v1010_v26, %v1006_v25  ;;  %v1038_v25 = vld [vmem:[#allocation11 + $0x4c8] sm:$0xff]  ;;  %v1065_v11 = vld [vmem:[#allocation11 + $0x5a0] sm:$0xff] }
 0x1d0   :  { %1804 = vmatprep.subr.bf16.mxu0 %v1803_v31  ;;  %1932 = vmatprep.subr.bf16.mxu1 %v1931_v32  ;;  %v1009_v31 = vld [vmem:[#allocation11 + $0x3e0] sm:$0xff]  ;;  %v1951_v32 = vpack.c.bf16 %v1012_v30, %v1008_v28  ;;  %v1042_v26 = vld [vmem:[#allocation11 + $0x4e8] sm:$0xff]  ;;  %v1040_v28 = vld [vmem:[#allocation11 + $0x4d8] sm:$0xff] }
 0x1d1   :  { %v1825_v33 = vpack.c.bf16 %v1009_v31, %v1005_v59  ;;  %v1037_v31 = vld [vmem:[#allocation11 + $0x4c0] sm:$0xff]  ;;  %v1068_v7 = vld [vmem:[#allocation11 + $0x5b8] sm:$0xff] }
 0x1d3   :  { %1806 = vmatpush1.bf16.msra.mxu0 %v1805_v39  ;;  %1934 = vmatpush1.bf16.msra.mxu1 %v1933_v40  ;;  %v1016_v39 = vld [vmem:[#allocation11 + $0x418] sm:$0xff]  ;;  %v1827_v40 = vpack.c.bf16 %v1018_v38, %v1014_v37  ;;  %v1046_v37 = vld [vmem:[#allocation11 + $0x508] sm:$0xff] }
 0x1d4   :  { %1808 = vmatprep.subr.bf16.mxu0 %v1807_v27  ;;  %1936 = vmatprep.subr.bf16.mxu1 %v1935_v43  ;;  %v1955_v42 = vpack.c.bf16 %v1020_v41, %v1016_v39  ;;  %v2405_v27 = vld [vmem:[#allocation10] sm:$0xf]  ;;  %v1050_v38 = vld [vmem:[#allocation11 + $0x528] sm:$0xff] }
 0x1d5   :  { %v580_v43 = vrot.slane %v2405_v27, %v2381_v58  ;;  %v584_v44 = vrot.slane %v2405_v27, %v2386_v60  ;;  %v592_v45 = vrot.slane %v2405_v27, %v2393_v2  ;;  %v1048_v39 = vld [vmem:[#allocation11 + $0x518] sm:$0xff] }
 0x1d7   :  { %1810 = vmatpush1.bf16.msra.mxu0 %v1809_v50  ;;  %1938 = vmatpush1.bf16.msra.mxu1 %v1937_v51 }
 0x1d8   :  { %1812 = vmatprep.subr.bf16.mxu0 %v1811_v54  ;;  %1940 = vmatprep.subr.bf16.mxu1 %v1939_v55  ;;  %v1019_v54 = vld [vmem:[#allocation11 + $0x430] sm:$0xff] }
 0x1db   :  { %1814 = vmatpush1.bf16.msra.mxu0 %v1813_v3  ;;  %1942 = vmatpush1.bf16.msra.mxu1 %v1941_v5  ;;  %v1829_v3 = vpack.c.bf16 %v1017_v52, %v1013_v48  ;;  %v1957_v5 = vpack.c.bf16 %v1019_v54, %v1015_v53  ;;  %v1047_v48 = vld [vmem:[#allocation11 + $0x510] sm:$0xff]  ;;  %v1056_v52 = vld [vmem:[#allocation11 + $0x558] sm:$0xff] }
 0x1dc   :  { %1816 = vmatprep.subr.bf16.mxu0 %v1815_v8  ;;  %1944 = vmatprep.subr.bf16.mxu1 %v1943_v9  ;;  %v1023_v9 = vld [vmem:[#allocation11 + $0x450] sm:$0xff]  ;;  %v1060_v53 = vld [vmem:[#allocation11 + $0x578] sm:$0xff] }
 0x1dd   :  { %v1975_v63 = vpack.c.bf16 %v1060_v53, %v1056_v52  ;;  %v1094_v52 = vld [vmem:[#allocation11 + $0x688] sm:$0xff] }
 0x1de   :  { %v1098_v53 = vld [vmem:[#allocation11 + $0x6a8] sm:$0xff] }
 0x1df   :  { %1818 = vmatpush1.bf16.msra.mxu0 %v1817_v16  ;;  %1946 = vmatpush1.bf16.msra.mxu1 %v1945_v17  ;;  %v1036_v16 = vld [vmem:[#allocation11 + $0x4b8] sm:$0xff] }
 0x1e0   :  { %1820 = vmatprep.subr.bf16.mxu0 %v1819_v18  ;;  %1948 = vmatprep.subr.bf16.mxu1 %v1947_v19  ;;  %v1961_v18 = vpack.c.bf16 %v1027_v10, %v1023_v9  ;;  %v1029_v19 = vld [vmem:[#allocation11 + $0x480] sm:$0xff]  ;;  %v1963_v22 = vpack.c.bf16 %v1036_v16, %v1032_v15  ;;  %v1067_v15 = vld [vmem:[#allocation11 + $0x5b0] sm:$0xff]  ;;  %v1070_v16 = vld [vmem:[#allocation11 + $0x5c8] sm:$0xff] }
 0x1e1   :  { %v1837_v30 = vpack.c.bf16 %v1033_v20, %v1029_v19  ;;  %v1061_v10 = vld [vmem:[#allocation11 + $0x580] sm:$0xff]  ;;  %v1981_v20 = vpack.c.bf16 %v1067_v15, %v1063_v14 }
 0x1e2   :  { %v1853_v19 = vpack.c.bf16 %v1065_v11, %v1061_v10 }
 0x1e3   :  { %1822 = vmatpush1.bf16.msra.mxu0 %v1821_v23  ;;  %1950 = vmatpush1.bf16.msra.mxu1 %v1949_v24  ;;  %v1031_v23 = vld [vmem:[#allocation11 + $0x490] sm:$0xff] }
 0x1e4   :  { %1824 = vmatprep.subr.bf16.mxu0 %v1823_v29  ;;  %1952 = vmatprep.subr.bf16.mxu1 %v1951_v32  ;;  %v1035_v24 = vld [vmem:[#allocation11 + $0x4b0] sm:$0xff]  ;;  %v1044_v29 = vld [vmem:[#allocation11 + $0x4f8] sm:$0xff]  ;;  %v1041_v32 = vld [vmem:[#allocation11 + $0x4e0] sm:$0xff] }
 0x1e5   :  { %v1965_v59 = vpack.c.bf16 %v1035_v24, %v1031_v23  ;;  %v1967_v34 = vpack.c.bf16 %v1044_v29, %v1040_v28  ;;  %v1841_v41 = vpack.c.bf16 %v1041_v32, %v1037_v31  ;;  %v1078_v28 = vld [vmem:[#allocation11 + $0x608] sm:$0xff] }
 0x1e6   :  { %v1082_v29 = vld [vmem:[#allocation11 + $0x628] sm:$0xff] }
 0x1e7   :  { %1826 = vmatpush1.bf16.msra.mxu0 %v1825_v33  ;;  %1954 = vmatpush1.bf16.msra.mxu1 %v1953_v36  ;;  %v1839_v33 = vpack.c.bf16 %v1042_v26, %v1038_v25  ;;  %v1043_v36 = vld [vmem:[#allocation11 + $0x4f0] sm:$0xff] }
 0x1e8   :  { %1828 = vmatprep.subr.bf16.mxu0 %v1827_v40  ;;  %1956 = vmatprep.subr.bf16.mxu1 %v1955_v42  ;;  %v1052_v40 = vld [vmem:[#allocation11 + $0x538] sm:$0xff]  ;;  %v1969_v42 = vpack.c.bf16 %v1043_v36, %v1039_v35  ;;  %v1071_v25 = vld [vmem:[#allocation11 + $0x5d0] sm:$0xff]  ;;  %v1859_v35 = vpack.c.bf16 %v1082_v29, %v1078_v28 }
 0x1e9   :  { %v1075_v26 = vld [vmem:[#allocation11 + $0x5f0] sm:$0xff] }
 0x1ea   :  { %v1985_v32 = vpack.c.bf16 %v1075_v26, %v1071_v25  ;;  %v1111_v28 = vld [vmem:[#allocation11 + $0x710] sm:$0xff] }
 0x1eb   :  { %v1115_v29 = vld [vmem:[#allocation11 + $0x730] sm:$0xff] }
 0x27d   :  { %v734_v46 = vpop.f32.mrb[2].mxu0  ;;  %v2413_v47 = vpop.f32.mrb[2].mxu1 }
 0x27e   :  { %v2019_v49 = vadd.f32 %v734_v46, %v580_v43  ;;  %v736_v50 = vpop.f32.mrb[3].mxu0  ;;  %v878_v51 = vpop.f32.mrb[3].mxu1  ;;  %v1045_v43 = vld [vmem:[#allocation11 + $0x500] sm:$0xff]  ;;  %v1971_v46 = vpack.c.bf16 %v1052_v40, %v1048_v39  ;;  %v1086_v39 = vld [vmem:[#allocation11 + $0x648] sm:$0xff] }
 0x27f   :  { %v2020_v55 = vadd.f32 %v736_v50, %v584_v44  ;;  %v2022_v61 = vadd.f32 %v878_v51, %v592_v45  ;;  %v1049_v44 = vld [vmem:[#allocation11 + $0x520] sm:$0xff]  ;;  %v1843_v45 = vpack.c.bf16 %v1050_v38, %v1046_v37  ;;  %v1054_v50 = vld [vmem:[#allocation11 + $0x548] sm:$0xff]  ;;  %v1079_v37 = vld [vmem:[#allocation11 + $0x610] sm:$0xff] }
 0x280   :  { %v881_v8 = vmax.f32 %v2019_v49, 0.0  ;;  %v1051_v49 = vld [vmem:[#allocation11 + $0x530] sm:$0xff]  ;;  %v1058_v51 = vld [vmem:[#allocation11 + $0x568] sm:$0xff]  ;;  %v1845_v54 = vpack.c.bf16 %v1049_v44, %v1045_v43 }
 0x281   :  { %v882_v1 = vmax.f32 %v2020_v55, 0.0  ;;  %v884_v17 = vmax.f32 %v2022_v61, 0.0  ;;  %v1973_v55 = vpack.c.bf16 %v1051_v49, %v1047_v48  ;;  %v1057_v61 = vld [vmem:[#allocation11 + $0x560] sm:$0xff]  ;;  %v1847_v62 = vpack.c.bf16 %v1058_v51, %v1054_v50  ;;  %v1083_v38 = vld [vmem:[#allocation11 + $0x630] sm:$0xff]  ;;  %v1090_v40 = vld [vmem:[#allocation11 + $0x668] sm:$0xff] }
 0x282   :  { %v1989_v44 = vpack.c.bf16 %v1083_v38, %v1079_v37  ;;  %v1863_v48 = vpack.c.bf16 %v1090_v40, %v1086_v39  ;;  %v1087_v50 = vld [vmem:[#allocation11 + $0x650] sm:$0xff] }
 0x283   :  { %1227 = vmatprep.mubr.f32.mxu0 %v882_v1  ;;  %1369 = vmatprep.mubr.f32.mxu1 %v882_v1  ;;  %v1059_v1 = vld [vmem:[#allocation11 + $0x570] sm:$0xff] }
 0x284   :  { %1228 = vmatmul.mubr.f32.vlgmr.msra.gmra.mrb[4].mxu0 %v881_v8  ;;  %1370 = vmatmul.mubr.f32.vlgmr.msra.gmra.mrb[4].mxu1 %v881_v8  ;;  %v1849_v8 = vpack.c.bf16 %v1057_v61, %v1053_v56  ;;  %v1977_v9 = vpack.c.bf16 %v1059_v1, %v1055_v0  ;;  %v1091_v51 = vld [vmem:[#allocation11 + $0x670] sm:$0xff]  ;;  %v1867_v0 = vpack.c.bf16 %v1098_v53, %v1094_v52 }
 0x285   :  { %1830 = vmatpush1.bf16.msra.mxu0 %v1829_v3  ;;  %1958 = vmatpush1.bf16.msra.mxu1 %v1957_v5  ;;  %v1062_v3 = vld [vmem:[#allocation11 + $0x588] sm:$0xff]  ;;  %v1993_v61 = vpack.c.bf16 %v1091_v51, %v1087_v50  ;;  %v1119_v39 = vld [vmem:[#allocation11 + $0x750] sm:$0xff] }
 0x286   :  { %1298 = vmatprep.mubr.f32.mxu0 %v884_v17  ;;  %1440 = vmatprep.mubr.f32.mxu1 %v884_v17  ;;  %v1066_v5 = vld [vmem:[#allocation11 + $0x5a8] sm:$0xff]  ;;  %v1123_v40 = vld [vmem:[#allocation11 + $0x770] sm:$0xff] }
 0x287   :  { %1832 = vmatprep.subr.bf16.mxu0 %v1831_v12  ;;  %1960 = vmatprep.subr.bf16.mxu1 %v1959_v13  ;;  %v1851_v12 = vpack.c.bf16 %v1066_v5, %v1062_v3  ;;  %v1979_v13 = vpack.c.bf16 %v1068_v7, %v1064_v6  ;;  %v1074_v17 = vld [vmem:[#allocation11 + $0x5e8] sm:$0xff]  ;;  %v1095_v3 = vld [vmem:[#allocation11 + $0x690] sm:$0xff] }
 0x288   :  { %v1855_v23 = vpack.c.bf16 %v1074_v17, %v1070_v16  ;;  %v1099_v5 = vld [vmem:[#allocation11 + $0x6b0] sm:$0xff]  ;;  %v1102_v6 = vld [vmem:[#allocation11 + $0x6c8] sm:$0xff] }
 0x289   :  { %1834 = vmatpush1.bf16.msra.mxu0 %v1833_v57  ;;  %1962 = vmatpush1.bf16.msra.mxu1 %v1961_v18  ;;  %v1072_v57 = vld [vmem:[#allocation11 + $0x5d8] sm:$0xff]  ;;  %v1106_v7 = vld [vmem:[#allocation11 + $0x6e8] sm:$0xff]  ;;  %v1997_v11 = vpack.c.bf16 %v1099_v5, %v1095_v3  ;;  %v1103_v16 = vld [vmem:[#allocation11 + $0x6d0] sm:$0xff] }
 0x28a   :  { %1836 = vmatprep.subr.bf16.mxu0 %v1835_v21  ;;  %1964 = vmatprep.subr.bf16.mxu1 %v1963_v22  ;;  %v1076_v18 = vld [vmem:[#allocation11 + $0x5f8] sm:$0xff]  ;;  %v1069_v21 = vld [vmem:[#allocation11 + $0x5c0] sm:$0xff]  ;;  %v1871_v14 = vpack.c.bf16 %v1106_v7, %v1102_v6  ;;  %v1107_v17 = vld [vmem:[#allocation11 + $0x6f0] sm:$0xff] }
 0x28b   :  { %v1073_v22 = vld [vmem:[#allocation11 + $0x5e0] sm:$0xff]  ;;  %v1983_v24 = vpack.c.bf16 %v1076_v18, %v1072_v57  ;;  %v1110_v57 = vld [vmem:[#allocation11 + $0x708] sm:$0xff]  ;;  %v1127_v52 = vld [vmem:[#allocation11 + $0x790] sm:$0xff] }
 0x28c   :  { %v1857_v31 = vpack.c.bf16 %v1073_v22, %v1069_v21  ;;  %v1114_v18 = vld [vmem:[#allocation11 + $0x728] sm:$0xff]  ;;  %v2001_v22 = vpack.c.bf16 %v1107_v17, %v1103_v16  ;;  %v1131_v53 = vld [vmem:[#allocation11 + $0x7b0] sm:$0xff]  ;;  %v1137_v6 = vld [vmem:[#allocation11 + $0x7e0] sm:$0xff] }
 0x28d   :  { %1838 = vmatpush1.bf16.msra.mxu0 %v1837_v30  ;;  %1966 = vmatpush1.bf16.msra.mxu1 %v1965_v59  ;;  %v1080_v30 = vld [vmem:[#allocation11 + $0x618] sm:$0xff]  ;;  %v1875_v25 = vpack.c.bf16 %v1114_v18, %v1110_v57  ;;  %v1135_v7 = vld [vmem:[#allocation11 + $0x7d0] sm:$0xff] }
 0x28e   :  { %1840 = vmatprep.subr.bf16.mxu0 %v1839_v33  ;;  %1968 = vmatprep.subr.bf16.mxu1 %v1967_v34  ;;  %v1084_v59 = vld [vmem:[#allocation11 + $0x638] sm:$0xff]  ;;  %v1077_v33 = vld [vmem:[#allocation11 + $0x600] sm:$0xff] }
 0x28f   :  { %v1081_v34 = vld [vmem:[#allocation11 + $0x620] sm:$0xff]  ;;  %v1987_v36 = vpack.c.bf16 %v1084_v59, %v1080_v30  ;;  %v1118_v30 = vld [vmem:[#allocation11 + $0x748] sm:$0xff] }
 0x290   :  { %v1861_v43 = vpack.c.bf16 %v1081_v34, %v1077_v33  ;;  %v1122_v59 = vld [vmem:[#allocation11 + $0x768] sm:$0xff]  ;;  %v2005_v34 = vpack.c.bf16 %v1115_v29, %v1111_v28 }
 0x291   :  { %1842 = vmatpush1.bf16.msra.mxu0 %v1841_v41  ;;  %1970 = vmatpush1.bf16.msra.mxu1 %v1969_v42  ;;  %v1088_v41 = vld [vmem:[#allocation11 + $0x658] sm:$0xff]  ;;  %v1879_v37 = vpack.c.bf16 %v1122_v59, %v1118_v30 }
 0x292   :  { %1844 = vmatprep.subr.bf16.mxu0 %v1843_v45  ;;  %1972 = vmatprep.subr.bf16.mxu1 %v1971_v46  ;;  %v1092_v42 = vld [vmem:[#allocation11 + $0x678] sm:$0xff]  ;;  %v1085_v45 = vld [vmem:[#allocation11 + $0x640] sm:$0xff] }
 0x293   :  { %v1089_v46 = vld [vmem:[#allocation11 + $0x660] sm:$0xff]  ;;  %v1991_v49 = vpack.c.bf16 %v1092_v42, %v1088_v41  ;;  %v1126_v41 = vld [vmem:[#allocation11 + $0x788] sm:$0xff] }
 0x294   :  { %v1865_v56 = vpack.c.bf16 %v1089_v46, %v1085_v45  ;;  %v1130_v42 = vld [vmem:[#allocation11 + $0x7a8] sm:$0xff]  ;;  %v2009_v46 = vpack.c.bf16 %v1123_v40, %v1119_v39 }
 0x295   :  { %1846 = vmatpush1.bf16.msra.mxu0 %v1845_v54  ;;  %1974 = vmatpush1.bf16.msra.mxu1 %v1973_v55  ;;  %v1096_v54 = vld [vmem:[#allocation11 + $0x698] sm:$0xff]  ;;  %v1883_v50 = vpack.c.bf16 %v1130_v42, %v1126_v41 }
 0x296   :  { %1848 = vmatprep.subr.bf16.mxu0 %v1847_v62  ;;  %1976 = vmatprep.subr.bf16.mxu1 %v1975_v63  ;;  %v1100_v55 = vld [vmem:[#allocation11 + $0x6b8] sm:$0xff]  ;;  %v1093_v62 = vld [vmem:[#allocation11 + $0x680] sm:$0xff] }
 0x297   :  { %v1097_v63 = vld [vmem:[#allocation11 + $0x6a0] sm:$0xff]  ;;  %v1995_v1 = vpack.c.bf16 %v1100_v55, %v1096_v54  ;;  %v1134_v54 = vld [vmem:[#allocation11 + $0x7c8] sm:$0xff] }
 0x298   :  { %v1869_v10 = vpack.c.bf16 %v1097_v63, %v1093_v62  ;;  %v1138_v55 = vld [vmem:[#allocation11 + $0x7e8] sm:$0xff]  ;;  %v2013_v63 = vpack.c.bf16 %v1131_v53, %v1127_v52 }
 0x299   :  { %1850 = vmatpush1.bf16.msra.mxu0 %v1849_v8  ;;  %1978 = vmatpush1.bf16.msra.mxu1 %v1977_v9  ;;  %v1104_v8 = vld [vmem:[#allocation11 + $0x6d8] sm:$0xff]  ;;  %v1887_v3 = vpack.c.bf16 %v1138_v55, %v1134_v54 }
 0x29a   :  { %1852 = vmatprep.subr.bf16.mxu0 %v1851_v12  ;;  %1980 = vmatprep.subr.bf16.mxu1 %v1979_v13  ;;  %v1108_v9 = vld [vmem:[#allocation11 + $0x6f8] sm:$0xff]  ;;  %v1101_v12 = vld [vmem:[#allocation11 + $0x6c0] sm:$0xff] }
 0x29b   :  { %v1105_v13 = vld [vmem:[#allocation11 + $0x6e0] sm:$0xff]  ;;  %v1999_v15 = vpack.c.bf16 %v1108_v9, %v1104_v8  ;;  %v1139_v8 = vld [vmem:[#allocation11 + $0x7f0] sm:$0xff] }
 0x29c   :  { %v1873_v21 = vpack.c.bf16 %v1105_v13, %v1101_v12 }
 0x29d   :  { %1854 = vmatpush1.bf16.msra.mxu0 %v1853_v19  ;;  %1982 = vmatpush1.bf16.msra.mxu1 %v1981_v20  ;;  %v1112_v19 = vld [vmem:[#allocation11 + $0x718] sm:$0xff] }
 0x29e   :  { %1856 = vmatprep.subr.bf16.mxu0 %v1855_v23  ;;  %1984 = vmatprep.subr.bf16.mxu1 %v1983_v24  ;;  %v1116_v20 = vld [vmem:[#allocation11 + $0x738] sm:$0xff]  ;;  %v1109_v23 = vld [vmem:[#allocation11 + $0x700] sm:$0xff] }
 0x29f   :  { %v1113_v24 = vld [vmem:[#allocation11 + $0x720] sm:$0xff]  ;;  %v2003_v26 = vpack.c.bf16 %v1116_v20, %v1112_v19 }
 0x2a0   :  { %v1877_v33 = vpack.c.bf16 %v1113_v24, %v1109_v23 }
 0x2a1   :  { %1858 = vmatpush1.bf16.msra.mxu0 %v1857_v31  ;;  %1986 = vmatpush1.bf16.msra.mxu1 %v1985_v32  ;;  %v1120_v31 = vld [vmem:[#allocation11 + $0x758] sm:$0xff] }
 0x2a2   :  { %1860 = vmatprep.subr.bf16.mxu0 %v1859_v35  ;;  %1988 = vmatprep.subr.bf16.mxu1 %v1987_v36  ;;  %v1124_v32 = vld [vmem:[#allocation11 + $0x778] sm:$0xff]  ;;  %v1117_v35 = vld [vmem:[#allocation11 + $0x740] sm:$0xff] }
 0x2a3   :  { %v1121_v36 = vld [vmem:[#allocation11 + $0x760] sm:$0xff]  ;;  %v2007_v38 = vpack.c.bf16 %v1124_v32, %v1120_v31 }
 0x2a4   :  { %v1881_v45 = vpack.c.bf16 %v1121_v36, %v1117_v35 }
 0x2a5   :  { %1862 = vmatpush1.bf16.msra.mxu0 %v1861_v43  ;;  %1990 = vmatpush1.bf16.msra.mxu1 %v1989_v44  ;;  %v1128_v43 = vld [vmem:[#allocation11 + $0x798] sm:$0xff] }
 0x2a6   :  { %1864 = vmatprep.subr.bf16.mxu0 %v1863_v48  ;;  %1992 = vmatprep.subr.bf16.mxu1 %v1991_v49  ;;  %v1132_v44 = vld [vmem:[#allocation11 + $0x7b8] sm:$0xff]  ;;  %v1125_v48 = vld [vmem:[#allocation11 + $0x780] sm:$0xff] }
 0x2a7   :  { %v1129_v49 = vld [vmem:[#allocation11 + $0x7a0] sm:$0xff]  ;;  %v2011_v51 = vpack.c.bf16 %v1132_v44, %v1128_v43 }
 0x2a8   :  { %v1885_v62 = vpack.c.bf16 %v1129_v49, %v1125_v48 }
 0x2a9   :  { %1866 = vmatpush1.bf16.msra.mxu0 %v1865_v56  ;;  %1994 = vmatpush1.bf16.msra.mxu1 %v1993_v61  ;;  %v1136_v56 = vld [vmem:[#allocation11 + $0x7d8] sm:$0xff] }
 0x2aa   :  { %1868 = vmatprep.subr.bf16.mxu0 %v1867_v0  ;;  %1996 = vmatprep.subr.bf16.mxu1 %v1995_v1  ;;  %v1140_v61 = vld [vmem:[#allocation11 + $0x7f8] sm:$0xff]  ;;  %v1133_v0 = vld [vmem:[#allocation11 + $0x7c0] sm:$0xff]  ;;  %v588_v1 = vrot.slane %v2405_v27, %v2400_v4 }
 0x2ab   :  { %v2015_v5 = vpack.c.bf16 %v1140_v61, %v1136_v56  ;;  %v1889_v9 = vpack.c.bf16 %v1137_v6, %v1133_v0  ;;  %v1141_v27 = vld [vmem:[#allocation13] sm:$0xf] }
 0x2ac   :  { %v1146_v13 = vrot.slane %v1141_v27, %v2381_v58  ;;  %v1158_v57 = vrot.slane %v1141_v27, %v2393_v2 }
 0x2ad   :  { %1870 = vmatpush1.bf16.msra.mxu0 %v1869_v10  ;;  %1998 = vmatpush1.bf16.msra.mxu1 %v1997_v11  ;;  %v2017_v10 = vpack.c.bf16 %v1139_v8, %v1135_v7  ;;  %v2021_v11 = vadd.f32 %v2413_v47, %v588_v1 }
 0x2ae   :  { %1872 = vmatprep.subr.bf16.mxu0 %v1871_v14  ;;  %2000 = vmatprep.subr.bf16.mxu1 %v1999_v15  ;;  %v1154_v14 = vrot.slane %v1141_v27, %v2400_v4  ;;  %v1150_v15 = vrot.slane %v1141_v27, %v2386_v60 }
 0x2af   :  { %v883_v12 = vmax.f32 %v2021_v11, 0.0 }
 0x2b1   :  { %1874 = vmatpush1.bf16.msra.mxu0 %v1873_v21  ;;  %2002 = vmatpush1.bf16.msra.mxu1 %v2001_v22 }
 0x2b2   :  { %1876 = vmatprep.subr.bf16.mxu0 %v1875_v25  ;;  %2004 = vmatprep.subr.bf16.mxu1 %v2003_v26 }
 0x2b5   :  { %1878 = vmatpush1.bf16.msra.mxu0 %v1877_v33  ;;  %2006 = vmatpush1.bf16.msra.mxu1 %v2005_v34 }
 0x2b6   :  { %1880 = vmatprep.subr.bf16.mxu0 %v1879_v37  ;;  %2008 = vmatprep.subr.bf16.mxu1 %v2007_v38 }
 0x2b9   :  { %1882 = vmatpush1.bf16.msra.mxu0 %v1881_v45  ;;  %2010 = vmatpush1.bf16.msra.mxu1 %v2009_v46 }
 0x2ba   :  { %1884 = vmatprep.subr.bf16.mxu0 %v1883_v50  ;;  %2012 = vmatprep.subr.bf16.mxu1 %v2011_v51 }
 0x2bd   :  { %1886 = vmatpush1.bf16.msra.mxu0 %v1885_v62  ;;  %2014 = vmatpush1.bf16.msra.mxu1 %v2013_v63 }
 0x2be   :  { %1888 = vmatprep.subr.bf16.mxu0 %v1887_v3  ;;  %2016 = vmatprep.subr.bf16.mxu1 %v2015_v5 }
 0x2c1   :  { %1890 = vmatpush1.bf16.msra.mxu0 %v1889_v9  ;;  %2018 = vmatpush1.bf16.msra.mxu1 %v2017_v10 }
 0x2c4   :  { %1299 = vmatmul.mubr.f32.vlgmr.msra.gmra.mrb[4].mxu0 %v883_v12  ;;  %1441 = vmatmul.mubr.f32.vlgmr.msra.gmra.mrb[4].mxu1 %v883_v12 }
 0x397   :  { %v1300_v16 = vpop.f32.mrb[4].mxu0  ;;  %v1442_v17 = vpop.f32.mrb[4].mxu1 }
 0x398   :  { %v2023_v18 = vadd.f32 %v1300_v16, %v1146_v13  ;;  %v1302_v47 = vpop.f32.mrb[5].mxu0  ;;  %v1444_v19 = vpop.f32.mrb[5].mxu1  ;;  %v2025_v20 = vadd.f32 %v1442_v17, %v1154_v14 }
 0x399   :  { %v2024_v21 = vadd.f32 %v1302_v47, %v1150_v15  ;;  %v2026_v24 = vadd.f32 %v1444_v19, %v1158_v57 }
 0x39a   :  { %v1447_v22 = vmax.f32 %v2023_v18, 0.0  ;;  %v1449_v25 = vmax.f32 %v2025_v20, 0.0 }
 0x39b   :  { %v1448_v23 = vmax.f32 %v2024_v21, 0.0  ;;  %v1450_v58 = vmax.f32 %v2026_v24, 0.0 }
 0x39d   :  { %v1451_v26 = vadd.f32 %v1448_v23, %v1447_v22 }
 0x39f   :  { %v1452_v4 = vadd.f32 %v1451_v26, %v1449_v25 }
 0x3a1   :  { %v1453_v28 = vadd.f32 %v1452_v4, %v1450_v58 }
 0x3a3   :  { %1454 = vst [vmem:[#allocation14] sm:$0xff] %v1453_v28 }
 0x3a4   :  { %2211 = shalt.err (!%p2208_p4)
}
 0x3a5   :  { %s2212_s13 = scalar_lea.hbm %s2441_s7, 128 }
 0x3a6   :  { %p2213_p5 = scmp.ne.s32.totalorder %s2441_s7, %s2212_s13  ;;  %p2216_p6 = scmp.lt.u32.totalorder %s2212_s13, %s2441_s7 }
 0x3a8   :  { %p2218_p7 = pnand %p2216_p6, %p2213_p5 }
 0x3aa   :  { %2221 = shalt.err (!%p2218_p7)
}
 0x3ab   :  { %1464 = dma.vmem_to_hbm [thread:$0]  %s1462_s8, 128, %s2441_s7, [#allocation4]  }
 0x3ac   :  { %2230 = dma.done.wait [#allocation4], 128  }
 0x3ad   :  { %2231 = vsyncadd [#allocation4], 4294967168 }
 0x3ae   :  { %1468 = vsyncpa [#allocation3], 1 }
 0x3af   :  { %1469 = vsyncpa [#allocation6], 1 }
 0x3b0   :  { %1470 = vsyncpa [#allocation9], 1 }
 0x3b1   :  { %1471 = vsyncpa [#allocation12], 1 }
 0x3b2   :  { %1472 = vsyncpa [#allocation4], 1 }

</bundles_post_ra>
